<compile_context>
chip_gen: v6e
topology: v6e:2x2x1
jax: 0.10.0
libtpu: 0.0.40
codegen_flags: <defaults>
</compile_context>

<pallas_src>
import functools

import jax
import jax.numpy as jnp
from jax.experimental import pallas as pl
from jax.experimental.pallas import tpu as pltpu


# ----------------------------------------------------------------------------
# Pallas kernel: one full encoder layer for one batch element.
# ----------------------------------------------------------------------------
def _encoder_layer_kernel(
    x_ref, pos_ref, kpmb_ref, maskb_ref,
    wqk_ref, bqk_ref, wv_ref, bv_ref,
    wo_ref, bo_ref,
    w1_ref, b1_ref, w2_ref, b2_ref,
    g1_ref, be1_ref, g2_ref, be2_ref,
    o_ref, *, nhead):
    x = x_ref[0].astype(jnp.float32)          # (S, D)
    pos = pos_ref[0].astype(jnp.float32)      # (S, D)
    # Hoisted additive attention bias: key-padding + attn-mask, computed once
    # (not re-broadcast/added per head inside the head loop).
    bias = kpmb_ref[0] + maskb_ref[...]       # (S, S), f32

    S, D = x.shape
    dh = D // nhead

    # --- projections: bf16 operands on the MXU, f32 accumulation ------------
    qk_in = (x + pos).astype(jnp.bfloat16)
    x_bf = x.astype(jnp.bfloat16)

    # Fused Q|K projection: one (S, 2D) matmul, then slice.  The 1/sqrt(dh)
    # query scale is pre-folded into wqk/bqk (host side), so no extra mul here.
    qk = jnp.dot(qk_in, wqk_ref[...], preferred_element_type=jnp.float32)
    qk = qk + bqk_ref[...]                                    # (S, 2D) f32
    q = qk[:, :D].astype(jnp.bfloat16)                        # (S, D) bf16
    k = qk[:, D:].astype(jnp.bfloat16)                        # (S, D) bf16
    v = (jnp.dot(x_bf, wv_ref[...], preferred_element_type=jnp.float32)
         + bv_ref[...]).astype(jnp.bfloat16)                  # (S, D) bf16

    # --- attention, with the output projection folded into the head loop ----
    attn = jnp.zeros((S, D), jnp.float32)
    for h in range(nhead):                    # static unrolled loop over heads
        lo, hi = h * dh, (h + 1) * dh
        # scores: contract over head dim without explicit transpose
        s = jax.lax.dot_general(q[:, lo:hi], k[:, lo:hi],
                                (((1,), (1,)), ((), ())),
                                preferred_element_type=jnp.float32)   # (S, S)
        s = s + bias                                          # mask add in f32
        s = s - jnp.max(s, axis=-1, keepdims=True)
        p = jnp.exp(s)                                        # softmax in f32
        p = p * pl.reciprocal(jnp.sum(p, axis=-1, keepdims=True), approx=True)
        head = jnp.dot(p.astype(jnp.bfloat16), v[:, lo:hi],
                       preferred_element_type=jnp.float32)    # (S, dh)
        # fold output projection: accumulate head @ wo[h] into full-D lanes
        attn = attn + jnp.dot(head.astype(jnp.bfloat16), wo_ref[h],
                              preferred_element_type=jnp.float32)     # (S, D)
    attn = attn + bo_ref[...]

    # --- residual + LayerNorm1 (dropout1 = identity in eval mode) -----------
    x1 = x + attn
    mu1 = jnp.mean(x1, axis=-1, keepdims=True)
    var1 = jnp.mean((x1 - mu1) ** 2, axis=-1, keepdims=True)
    xn1 = (x1 - mu1) * jax.lax.rsqrt(var1 + 1e-5) * g1_ref[...] + be1_ref[...]

    # --- FFN: linear2(relu(linear1(x)))  (inner dropout = identity) ---------
    h1 = jnp.maximum(
        jnp.dot(xn1.astype(jnp.bfloat16), w1_ref[...],
                preferred_element_type=jnp.float32) + b1_ref[...], 0.0)
    ff = jnp.dot(h1.astype(jnp.bfloat16), w2_ref[...],
                 preferred_element_type=jnp.float32) + b2_ref[...]

    # --- residual + LayerNorm2 (dropout2 = identity in eval mode) -----------
    x2 = xn1 + ff
    mu2 = jnp.mean(x2, axis=-1, keepdims=True)
    var2 = jnp.mean((x2 - mu2) ** 2, axis=-1, keepdims=True)
    o_ref[0] = ((x2 - mu2) * jax.lax.rsqrt(var2 + 1e-5) * g2_ref[...]
                + be2_ref[...]).astype(o_ref.dtype)


# ----------------------------------------------------------------------------
# Cost / VMEM sizing helpers.
# ----------------------------------------------------------------------------
def _cost_and_vmem(B, S, D, DFF, nhead):
    # MXU flops per batch element (2*M*N*K per matmul).
    flops = (2 * S * (2 * D) * D          # fused QK projection
             + 2 * S * D * D              # V projection
             + 2 * S * S * D              # QK^T scores, all heads
             + 2 * S * S * D              # P @ V, all heads
             + 2 * S * D * D              # output projection (folded)
             + 2 * 2 * S * D * DFF)       # FFN (two linears)
    trans = nhead * S * S + nhead * S     # exp + approx reciprocal
    w_bytes = 2 * (2 * D * D + D * D + D * D + 2 * D * DFF)   # bf16 weights
    b_bytes = 4 * (2 * D + D + D + DFF + D + 4 * D)           # f32 biases / LN
    io_bytes = B * (3 * S * D * 4 + S * 4) + S * S * 4
    cost = pl.CostEstimate(flops=B * flops,
                           transcendentals=B * trans,
                           bytes_accessed=w_bytes + b_bytes + io_bytes)
    # Scoped-VMEM sizing: weights + double-buffered sequence blocks + f32
    # activations/scores, with 2x headroom, clamped to a safe range.
    act_bytes = 4 * (8 * S * D + 3 * S * S + 2 * S * DFF + S * 2 * D)
    vmem = w_bytes + b_bytes + 2 * 2 * S * D * 4 + act_bytes
    vmem = int(min(max(2 * vmem, 32 * 1024 * 1024), 96 * 1024 * 1024))
    # TODO(synk): on v7x (64 MiB physical VMEM) cap this lower and tile the
    # FFN / scores over the query axis for DETR-scale sequence lengths.
    return cost, vmem


def _prepare_layer_params(p, nhead):
    """Kernel-side parameter layout: fused QK weight with the query scale
    folded in, bf16 weights, wo split per head as (nhead, dh, D) so the head
    loop indexes the leading axis."""
    D = p["wo_t"].shape[0]
    dh = D // nhead
    scale = jnp.float32(1.0 / (dh ** 0.5))
    return dict(
        wqk_t=jnp.concatenate([p["wq_t"] * scale, p["wk_t"]],
                              axis=1).astype(jnp.bfloat16),
        bqk=jnp.concatenate([p["bq"] * scale, p["bk"]], axis=1),
        wv_t=p["wv_t"].astype(jnp.bfloat16), bv=p["bv"],
        wo_t=p["wo_t"].reshape(nhead, dh, D).astype(jnp.bfloat16), bo=p["bo"],
        w1_t=p["w1_t"].astype(jnp.bfloat16), b1=p["b1"],
        w2_t=p["w2_t"].astype(jnp.bfloat16), b2=p["b2"],
        g1=p["g1"], be1=p["be1"], g2=p["g2"], be2=p["be2"],
    )


def _encoder_layer_pallas(x, pos, kpm_bias, mask_bias, kp, nhead):
    """x, pos: (B, S, D) f32; kpm_bias: (B, 1, S) f32; mask_bias: (S, S) f32."""
    B, S, D = x.shape
    DFF = kp["w1_t"].shape[1]

    seq_spec = pl.BlockSpec((1, S, D), lambda b: (b, 0, 0))
    kpm_spec = pl.BlockSpec((1, 1, S), lambda b: (b, 0, 0))

    def full(a):
        # constant index_map -> weights stay resident in VMEM across the grid
        return pl.BlockSpec(a.shape, lambda b, _nd=a.ndim: (0,) * _nd)

    args = (x, pos, kpm_bias, mask_bias,
            kp["wqk_t"], kp["bqk"], kp["wv_t"], kp["bv"],
            kp["wo_t"], kp["bo"], kp["w1_t"], kp["b1"], kp["w2_t"], kp["b2"],
            kp["g1"], kp["be1"], kp["g2"], kp["be2"])
    in_specs = [seq_spec, seq_spec, kpm_spec, full(mask_bias)] + \
               [full(a) for a in args[4:]]

    cost, vmem_bytes = _cost_and_vmem(B, S, D, DFF, nhead)

    return pl.pallas_call(
        functools.partial(_encoder_layer_kernel, nhead=nhead),
        out_shape=jax.ShapeDtypeStruct((B, S, D), jnp.float32),
        grid=(B,),
        in_specs=in_specs,
        out_specs=seq_spec,
        compiler_params=pltpu.CompilerParams(
            dimension_semantics=("parallel",),
            vmem_limit_bytes=vmem_bytes),
        cost_estimate=cost,
    )(*args)


# ----------------------------------------------------------------------------
# TransformerEncoder forward (mirrors the PyTorch module's forward signature).
# ----------------------------------------------------------------------------
def transformer_encoder(src, mask=None, src_key_padding_mask=None, pos=None,
                        num_zeros=None, *, params, nhead):
    S, B, D = src.shape

    # num_zeros: prepend zero positional embeddings for the extra tokens.
    if pos is not None and num_zeros is not None:
        pos = jnp.concatenate(
            [jnp.zeros((num_zeros,) + pos.shape[1:], pos.dtype), pos], axis=0)
    if pos is None:
        pos = jnp.zeros_like(src)

    x = jnp.transpose(src, (1, 0, 2)).astype(jnp.float32)    # (B, S, D)
    posb = jnp.transpose(pos, (1, 0, 2)).astype(jnp.float32)

    if src_key_padding_mask is None:
        kpm_bias = jnp.zeros((B, 1, S), jnp.float32)
    else:
        kpm_bias = (src_key_padding_mask.astype(jnp.float32)[:, None, :]
                    * jnp.float32(-1e30))

    if mask is None:
        mask_bias = jnp.zeros((S, S), jnp.float32)
    elif mask.dtype == jnp.bool_:
        mask_bias = jnp.where(mask, jnp.float32(-1e30), jnp.float32(0.0))
    else:
        mask_bias = mask.astype(jnp.float32)

    kparams = [_prepare_layer_params(p, nhead) for p in params]
    for kp in kparams:
        x = _encoder_layer_pallas(x, posb, kpm_bias, mask_bias, kp, nhead)
    return jnp.transpose(x, (1, 0, 2))


# ----------------------------------------------------------------------------
# Pure-JAX reference (same math; bf16 matmul operands to match the kernel's
# numerics, exact softmax) for correctness checking.
# ----------------------------------------------------------------------------
def _layer_ref(x, pos, kpm_bias, mask_bias, p, nhead):
    B, S, D = x.shape
    dh = D // nhead
    bf16 = jnp.bfloat16

    def mm(a, w):
        return jnp.einsum("...d,de->...e", a.astype(bf16), w.astype(bf16),
                          preferred_element_type=jnp.float32)

    qk = x + pos
    q = mm(qk, p["wq_t"]) + p["bq"]
    k = mm(qk, p["wk_t"]) + p["bk"]
    v = mm(x, p["wv_t"]) + p["bv"]
    qh = (q.reshape(B, S, nhead, dh).transpose(0, 2, 1, 3)
          * (dh ** -0.5)).astype(bf16)
    kh = k.reshape(B, S, nhead, dh).transpose(0, 2, 1, 3).astype(bf16)
    vh = v.reshape(B, S, nhead, dh).transpose(0, 2, 1, 3).astype(bf16)
    s = jnp.einsum("bhqd,bhkd->bhqk", qh, kh, preferred_element_type=jnp.float32)
    s = s + kpm_bias[:, None, :, :] + mask_bias[None, None, :, :]
    pr = jax.nn.softmax(s, axis=-1)
    o = jnp.einsum("bhqk,bhkd->bhqd", pr.astype(bf16), vh,
                   preferred_element_type=jnp.float32)
    o = o.transpose(0, 2, 1, 3).reshape(B, S, D)
    o = mm(o, p["wo_t"]) + p["bo"]

    def ln(y, g, b):
        mu = jnp.mean(y, -1, keepdims=True)
        var = jnp.mean((y - mu) ** 2, -1, keepdims=True)
        return (y - mu) * jax.lax.rsqrt(var + 1e-5) * g + b

    x1 = ln(x + o, p["g1"], p["be1"])
    ff = mm(jnp.maximum(mm(x1, p["w1_t"]) + p["b1"], 0.0), p["w2_t"]) + p["b2"]
    return ln(x1 + ff, p["g2"], p["be2"])


def transformer_encoder_ref(src, mask, src_key_padding_mask, pos, num_zeros,
                            *, params, nhead):
    S, B, D = src.shape
    if pos is not None and num_zeros is not None:
        pos = jnp.concatenate(
            [jnp.zeros((num_zeros,) + pos.shape[1:], pos.dtype), pos], axis=0)
    if pos is None:
        pos = jnp.zeros_like(src)
    x = jnp.transpose(src, (1, 0, 2)).astype(jnp.float32)
    posb = jnp.transpose(pos, (1, 0, 2)).astype(jnp.float32)
    if src_key_padding_mask is None:
        kpm_bias = jnp.zeros((B, 1, S), jnp.float32)
    else:
        kpm_bias = (src_key_padding_mask.astype(jnp.float32)[:, None, :]
                    * jnp.float32(-1e30))
    mask_bias = (jnp.zeros((S, S), jnp.float32) if mask is None
                 else jnp.where(mask, jnp.float32(-1e30), 0.0)
                 if mask.dtype == jnp.bool_ else mask.astype(jnp.float32))
    for p in params:
        x = _layer_ref(x, posb, kpm_bias, mask_bias, p, nhead)
    return jnp.transpose(x, (1, 0, 2))


# ----------------------------------------------------------------------------
# Deterministic synthetic parameter initialization (shapes per encoder layer:
# in_proj (3D,D)+(3D,), out_proj (D,D)+(D,), linear1 (Dff,D)+(Dff,),
# linear2 (D,Dff)+(D,), two LayerNorms (D,)+(D,)). Weights are stored
# pre-transposed; biases stored as (1, N).
# ----------------------------------------------------------------------------
def init_params(key, num_layers, d_model, dff):
    layers = []
    for _ in range(num_layers):
        key, *ks = jax.random.split(key, 13)
        n = lambda k, shp: 0.05 * jax.random.normal(k, shp, jnp.float32)
        layers.append(dict(
            wq_t=n(ks[0], (d_model, d_model)), bq=n(ks[1], (1, d_model)),
            wk_t=n(ks[2], (d_model, d_model)), bk=n(ks[3], (1, d_model)),
            wv_t=n(ks[4], (d_model, d_model)), bv=n(ks[5], (1, d_model)),
            wo_t=n(ks[6], (d_model, d_model)), bo=n(ks[7], (1, d_model)),
            w1_t=n(ks[8], (d_model, dff)),     b1=n(ks[9], (1, dff)),
            w2_t=n(ks[10], (dff, d_model)),    b2=n(ks[11], (1, d_model)),
            g1=jnp.ones((1, d_model), jnp.float32),
            be1=jnp.zeros((1, d_model), jnp.float32),
            g2=jnp.ones((1, d_model), jnp.float32),
            be2=jnp.zeros((1, d_model), jnp.float32),
        ))
    return layers


if __name__ == "__main__":
    # Small shapes consistent with the module: S=8 tokens, B=2, d_model=32,
    # nhead=4, dim_feedforward=64, num_layers=2, num_zeros=2 extra tokens.
    B, S, D, H, DFF, L = 2, 8, 32, 4, 64, 2
    num_zeros = 2

    key = jax.random.PRNGKey(0)
    k_src, k_pos, k_par = jax.random.split(key, 3)
    src = jax.random.normal(k_src, (S, B, D), jnp.float32)
    pos = jax.random.normal(k_pos, (S - num_zeros, B, D), jnp.float32)
    # key padding mask: last position of batch element 1 is padded
    kpm = jnp.zeros((B, S), jnp.bool_).at[1, S - 1].set(True)
    # TODO(synk): dropout layers are treated as identity (eval-mode semantics).

    params = init_params(k_par, L, D, DFF)

    out = transformer_encoder(src, mask=None, src_key_padding_mask=kpm,
                              pos=pos, num_zeros=num_zeros,
                              params=params, nhead=H)
    out = jax.block_until_ready(out)

    ref = transformer_encoder_ref(src, None, kpm, pos, num_zeros,
                                  params=params, nhead=H)
    assert out.shape == (S, B, D)
    # bf16 matmul operands + EUP approx reciprocal vs exact-softmax reference.
    assert jnp.allclose(out, ref, atol=2e-2, rtol=2e-2), "mismatch vs reference"
    print("KERNEL_OK")
</pallas_src>

<mosaic_0001>
module attributes {stable_mosaic.version = 11 : i64} {
  func.func @_encoder_layer_kernel(%arg0: i32, %arg1: memref<1x8x32xf32, #tpu.memory_space<vmem>>, %arg2: memref<1x8x32xf32, #tpu.memory_space<vmem>>, %arg3: memref<1x1x8xf32, #tpu.memory_space<vmem>>, %arg4: memref<8x8xf32, #tpu.memory_space<vmem>>, %arg5: memref<32x64xbf16, #tpu.memory_space<vmem>>, %arg6: memref<1x64xf32, #tpu.memory_space<vmem>>, %arg7: memref<32x32xbf16, #tpu.memory_space<vmem>>, %arg8: memref<1x32xf32, #tpu.memory_space<vmem>>, %arg9: memref<4x8x32xbf16, #tpu.memory_space<vmem>>, %arg10: memref<1x32xf32, #tpu.memory_space<vmem>>, %arg11: memref<32x64xbf16, #tpu.memory_space<vmem>>, %arg12: memref<1x64xf32, #tpu.memory_space<vmem>>, %arg13: memref<64x32xbf16, #tpu.memory_space<vmem>>, %arg14: memref<1x32xf32, #tpu.memory_space<vmem>>, %arg15: memref<1x32xf32, #tpu.memory_space<vmem>>, %arg16: memref<1x32xf32, #tpu.memory_space<vmem>>, %arg17: memref<1x32xf32, #tpu.memory_space<vmem>>, %arg18: memref<1x32xf32, #tpu.memory_space<vmem>>, %arg19: memref<1x8x32xf32, #tpu.memory_space<vmem>>) attributes {dimension_semantics = [#tpu.dimension_semantics<parallel>], iteration_bounds = array<i64: 2>, scalar_prefetch = 0 : i64, scratch_operands = 0 : i64, tpu.core_type = #tpu.core_type<tc>, window_params = [{transform_indices = @transform_0, window_bounds = array<i64: 1, 8, 32>}, {transform_indices = @transform_1, window_bounds = array<i64: 1, 8, 32>}, {transform_indices = @transform_2, window_bounds = array<i64: 1, 1, 8>}, {pipeline_mode = #tpu.pipeline_mode<synchronous>, transform_indices = @transform_3, window_bounds = array<i64: 8, 8>}, {pipeline_mode = #tpu.pipeline_mode<synchronous>, transform_indices = @transform_4, window_bounds = array<i64: 32, 64>}, {pipeline_mode = #tpu.pipeline_mode<synchronous>, transform_indices = @transform_5, window_bounds = array<i64: 1, 64>}, {pipeline_mode = #tpu.pipeline_mode<synchronous>, transform_indices = @transform_6, window_bounds = array<i64: 32, 32>}, {pipeline_mode = #tpu.pipeline_mode<synchronous>, transform_indices = @transform_7, window_bounds = array<i64: 1, 32>}, {pipeline_mode = #tpu.pipeline_mode<synchronous>, transform_indices = @transform_8, window_bounds = array<i64: 4, 8, 32>}, {pipeline_mode = #tpu.pipeline_mode<synchronous>, transform_indices = @transform_9, window_bounds = array<i64: 1, 32>}, {pipeline_mode = #tpu.pipeline_mode<synchronous>, transform_indices = @transform_10, window_bounds = array<i64: 32, 64>}, {pipeline_mode = #tpu.pipeline_mode<synchronous>, transform_indices = @transform_11, window_bounds = array<i64: 1, 64>}, {pipeline_mode = #tpu.pipeline_mode<synchronous>, transform_indices = @transform_12, window_bounds = array<i64: 64, 32>}, {pipeline_mode = #tpu.pipeline_mode<synchronous>, transform_indices = @transform_13, window_bounds = array<i64: 1, 32>}, {pipeline_mode = #tpu.pipeline_mode<synchronous>, transform_indices = @transform_14, window_bounds = array<i64: 1, 32>}, {pipeline_mode = #tpu.pipeline_mode<synchronous>, transform_indices = @transform_15, window_bounds = array<i64: 1, 32>}, {pipeline_mode = #tpu.pipeline_mode<synchronous>, transform_indices = @transform_16, window_bounds = array<i64: 1, 32>}, {pipeline_mode = #tpu.pipeline_mode<synchronous>, transform_indices = @transform_17, window_bounds = array<i64: 1, 32>}, {transform_indices = @transform_18, window_bounds = array<i64: 1, 8, 32>}]} {
    %c0 = arith.constant 0 : index
    %c0_0 = arith.constant 0 : index
    %c0_1 = arith.constant 0 : index
    %0 = vector.load %arg1[%c0, %c0_0, %c0_1] : memref<1x8x32xf32, #tpu.memory_space<vmem>>, vector<1x8x32xf32>
    %1 = vector.shape_cast %0 : vector<1x8x32xf32> to vector<8x32xf32>
    %c0_2 = arith.constant 0 : index
    %c0_3 = arith.constant 0 : index
    %c0_4 = arith.constant 0 : index
    %2 = vector.load %arg2[%c0_2, %c0_3, %c0_4] : memref<1x8x32xf32, #tpu.memory_space<vmem>>, vector<1x8x32xf32>
    %3 = vector.shape_cast %2 : vector<1x8x32xf32> to vector<8x32xf32>
    %c0_5 = arith.constant 0 : index
    %c0_6 = arith.constant 0 : index
    %c0_7 = arith.constant 0 : index
    %4 = vector.load %arg3[%c0_5, %c0_6, %c0_7] : memref<1x1x8xf32, #tpu.memory_space<vmem>>, vector<1x1x8xf32>
    %5 = vector.shape_cast %4 : vector<1x1x8xf32> to vector<1x8xf32>
    %c0_8 = arith.constant 0 : index
    %c0_9 = arith.constant 0 : index
    %6 = vector.load %arg4[%c0_8, %c0_9] : memref<8x8xf32, #tpu.memory_space<vmem>>, vector<8x8xf32>
    %7 = vector.broadcast %5 : vector<1x8xf32> to vector<8x8xf32>
    %8 = arith.addf %7, %6 : vector<8x8xf32>
    %9 = arith.addf %1, %3 : vector<8x32xf32>
    %10 = arith.truncf %9 : vector<8x32xf32> to vector<8x32xbf16>
    %11 = arith.truncf %1 : vector<8x32xf32> to vector<8x32xbf16>
    %c0_10 = arith.constant 0 : index
    %c0_11 = arith.constant 0 : index
    %12 = vector.load %arg5[%c0_10, %c0_11] : memref<32x64xbf16, #tpu.memory_space<vmem>>, vector<32x64xbf16>
    %cst = arith.constant dense<0.000000e+00> : vector<8x64xf32>
    %13 = tpu.matmul %10, %12, %cst {dimension_numbers = #tpu.dot_dimension_numbers<[1], [0], [0], [1], [0, 0, 1, 1], [], []>} : vector<8x32xbf16>, vector<32x64xbf16>, vector<8x64xf32> -> vector<8x64xf32>
    %c0_12 = arith.constant 0 : index
    %c0_13 = arith.constant 0 : index
    %14 = vector.load %arg6[%c0_12, %c0_13] : memref<1x64xf32, #tpu.memory_space<vmem>>, vector<1x64xf32>
    %15 = vector.broadcast %14 : vector<1x64xf32> to vector<8x64xf32>
    %16 = arith.addf %13, %15 : vector<8x64xf32>
    %17 = vector.extract_strided_slice %16 {offsets = [0, 0], sizes = [8, 32], strides = [1, 1]} : vector<8x64xf32> to vector<8x32xf32>
    %18 = arith.truncf %17 : vector<8x32xf32> to vector<8x32xbf16>
    %19 = vector.extract_strided_slice %16 {offsets = [0, 32], sizes = [8, 32], strides = [1, 1]} : vector<8x64xf32> to vector<8x32xf32>
    %20 = arith.truncf %19 : vector<8x32xf32> to vector<8x32xbf16>
    %c0_14 = arith.constant 0 : index
    %c0_15 = arith.constant 0 : index
    %21 = vector.load %arg7[%c0_14, %c0_15] : memref<32x32xbf16, #tpu.memory_space<vmem>>, vector<32x32xbf16>
    %cst_16 = arith.constant dense<0.000000e+00> : vector<8x32xf32>
    %22 = tpu.matmul %11, %21, %cst_16 {dimension_numbers = #tpu.dot_dimension_numbers<[1], [0], [0], [1], [0, 0, 1, 1], [], []>} : vector<8x32xbf16>, vector<32x32xbf16>, vector<8x32xf32> -> vector<8x32xf32>
    %c0_17 = arith.constant 0 : index
    %c0_18 = arith.constant 0 : index
    %23 = vector.load %arg8[%c0_17, %c0_18] : memref<1x32xf32, #tpu.memory_space<vmem>>, vector<1x32xf32>
    %24 = vector.broadcast %23 : vector<1x32xf32> to vector<8x32xf32>
    %25 = arith.addf %22, %24 : vector<8x32xf32>
    %26 = arith.truncf %25 : vector<8x32xf32> to vector<8x32xbf16>
    %cst_19 = arith.constant 0.000000e+00 : f32
    %27 = vector.broadcast %cst_19 : f32 to vector<8x32xf32>
    %28 = vector.extract_strided_slice %18 {offsets = [0, 0], sizes = [8, 8], strides = [1, 1]} : vector<8x32xbf16> to vector<8x8xbf16>
    %29 = vector.extract_strided_slice %20 {offsets = [0, 0], sizes = [8, 8], strides = [1, 1]} : vector<8x32xbf16> to vector<8x8xbf16>
    %cst_20 = arith.constant dense<0.000000e+00> : vector<8x8xf32>
    %30 = tpu.matmul %28, %29, %cst_20 {dimension_numbers = #tpu.dot_dimension_numbers<[1], [1], [0], [0], [0, 0, 1, 0], [], []>} : vector<8x8xbf16>, vector<8x8xbf16>, vector<8x8xf32> -> vector<8x8xf32>
    %31 = arith.addf %30, %8 : vector<8x8xf32>
    %cst_21 = arith.constant dense<0xFF800000> : vector<8xf32>
    %32 = vector.multi_reduction <maximumf>, %31, %cst_21 [1] : vector<8x8xf32> to vector<8xf32>
    %33 = vector.shape_cast %32 : vector<8xf32> to vector<8x1xf32>
    %34 = vector.broadcast %33 : vector<8x1xf32> to vector<8x8xf32>
    %35 = arith.subf %31, %34 : vector<8x8xf32>
    %36 = math.exp %35 : vector<8x8xf32>
    %cst_22 = arith.constant dense<0.000000e+00> : vector<8xf32>
    %37 = vector.multi_reduction <add>, %36, %cst_22 [1] : vector<8x8xf32> to vector<8xf32>
    %38 = vector.shape_cast %37 : vector<8xf32> to vector<8x1xf32>
    %39 = tpu.reciprocal %38 {approx = true} : vector<8x1xf32> -> vector<8x1xf32>
    %40 = vector.broadcast %39 : vector<8x1xf32> to vector<8x8xf32>
    %41 = arith.mulf %36, %40 : vector<8x8xf32>
    %42 = arith.truncf %41 : vector<8x8xf32> to vector<8x8xbf16>
    %43 = vector.extract_strided_slice %26 {offsets = [0, 0], sizes = [8, 8], strides = [1, 1]} : vector<8x32xbf16> to vector<8x8xbf16>
    %cst_23 = arith.constant dense<0.000000e+00> : vector<8x8xf32>
    %44 = tpu.matmul %42, %43, %cst_23 {dimension_numbers = #tpu.dot_dimension_numbers<[1], [0], [0], [1], [0, 0, 1, 1], [], []>} : vector<8x8xbf16>, vector<8x8xbf16>, vector<8x8xf32> -> vector<8x8xf32>
    %45 = arith.truncf %44 : vector<8x8xf32> to vector<8x8xbf16>
    %c0_24 = arith.constant 0 : index
    %c0_25 = arith.constant 0 : index
    %c0_26 = arith.constant 0 : index
    %46 = vector.load %arg9[%c0_24, %c0_25, %c0_26] : memref<4x8x32xbf16, #tpu.memory_space<vmem>>, vector<1x8x32xbf16>
    %47 = vector.shape_cast %46 : vector<1x8x32xbf16> to vector<8x32xbf16>
    %cst_27 = arith.constant dense<0.000000e+00> : vector<8x32xf32>
    %48 = tpu.matmul %45, %47, %cst_27 {dimension_numbers = #tpu.dot_dimension_numbers<[1], [0], [0], [1], [0, 0, 1, 1], [], []>} : vector<8x8xbf16>, vector<8x32xbf16>, vector<8x32xf32> -> vector<8x32xf32>
    %49 = arith.addf %27, %48 : vector<8x32xf32>
    %50 = vector.extract_strided_slice %18 {offsets = [0, 8], sizes = [8, 8], strides = [1, 1]} : vector<8x32xbf16> to vector<8x8xbf16>
    %51 = vector.extract_strided_slice %20 {offsets = [0, 8], sizes = [8, 8], strides = [1, 1]} : vector<8x32xbf16> to vector<8x8xbf16>
    %cst_28 = arith.constant dense<0.000000e+00> : vector<8x8xf32>
    %52 = tpu.matmul %50, %51, %cst_28 {dimension_numbers = #tpu.dot_dimension_numbers<[1], [1], [0], [0], [0, 0, 1, 0], [], []>} : vector<8x8xbf16>, vector<8x8xbf16>, vector<8x8xf32> -> vector<8x8xf32>
    %53 = arith.addf %52, %8 : vector<8x8xf32>
    %cst_29 = arith.constant dense<0xFF800000> : vector<8xf32>
    %54 = vector.multi_reduction <maximumf>, %53, %cst_29 [1] : vector<8x8xf32> to vector<8xf32>
    %55 = vector.shape_cast %54 : vector<8xf32> to vector<8x1xf32>
    %56 = vector.broadcast %55 : vector<8x1xf32> to vector<8x8xf32>
    %57 = arith.subf %53, %56 : vector<8x8xf32>
    %58 = math.exp %57 : vector<8x8xf32>
    %cst_30 = arith.constant dense<0.000000e+00> : vector<8xf32>
    %59 = vector.multi_reduction <add>, %58, %cst_30 [1] : vector<8x8xf32> to vector<8xf32>
    %60 = vector.shape_cast %59 : vector<8xf32> to vector<8x1xf32>
    %61 = tpu.reciprocal %60 {approx = true} : vector<8x1xf32> -> vector<8x1xf32>
    %62 = vector.broadcast %61 : vector<8x1xf32> to vector<8x8xf32>
    %63 = arith.mulf %58, %62 : vector<8x8xf32>
    %64 = arith.truncf %63 : vector<8x8xf32> to vector<8x8xbf16>
    %65 = vector.extract_strided_slice %26 {offsets = [0, 8], sizes = [8, 8], strides = [1, 1]} : vector<8x32xbf16> to vector<8x8xbf16>
    %cst_31 = arith.constant dense<0.000000e+00> : vector<8x8xf32>
    %66 = tpu.matmul %64, %65, %cst_31 {dimension_numbers = #tpu.dot_dimension_numbers<[1], [0], [0], [1], [0, 0, 1, 1], [], []>} : vector<8x8xbf16>, vector<8x8xbf16>, vector<8x8xf32> -> vector<8x8xf32>
    %67 = arith.truncf %66 : vector<8x8xf32> to vector<8x8xbf16>
    %c1 = arith.constant 1 : index
    %c0_32 = arith.constant 0 : index
    %c0_33 = arith.constant 0 : index
    %68 = vector.load %arg9[%c1, %c0_32, %c0_33] : memref<4x8x32xbf16, #tpu.memory_space<vmem>>, vector<1x8x32xbf16>
    %69 = vector.shape_cast %68 : vector<1x8x32xbf16> to vector<8x32xbf16>
    %cst_34 = arith.constant dense<0.000000e+00> : vector<8x32xf32>
    %70 = tpu.matmul %67, %69, %cst_34 {dimension_numbers = #tpu.dot_dimension_numbers<[1], [0], [0], [1], [0, 0, 1, 1], [], []>} : vector<8x8xbf16>, vector<8x32xbf16>, vector<8x32xf32> -> vector<8x32xf32>
    %71 = arith.addf %49, %70 : vector<8x32xf32>
    %72 = vector.extract_strided_slice %18 {offsets = [0, 16], sizes = [8, 8], strides = [1, 1]} : vector<8x32xbf16> to vector<8x8xbf16>
    %73 = vector.extract_strided_slice %20 {offsets = [0, 16], sizes = [8, 8], strides = [1, 1]} : vector<8x32xbf16> to vector<8x8xbf16>
    %cst_35 = arith.constant dense<0.000000e+00> : vector<8x8xf32>
    %74 = tpu.matmul %72, %73, %cst_35 {dimension_numbers = #tpu.dot_dimension_numbers<[1], [1], [0], [0], [0, 0, 1, 0], [], []>} : vector<8x8xbf16>, vector<8x8xbf16>, vector<8x8xf32> -> vector<8x8xf32>
    %75 = arith.addf %74, %8 : vector<8x8xf32>
    %cst_36 = arith.constant dense<0xFF800000> : vector<8xf32>
    %76 = vector.multi_reduction <maximumf>, %75, %cst_36 [1] : vector<8x8xf32> to vector<8xf32>
    %77 = vector.shape_cast %76 : vector<8xf32> to vector<8x1xf32>
    %78 = vector.broadcast %77 : vector<8x1xf32> to vector<8x8xf32>
    %79 = arith.subf %75, %78 : vector<8x8xf32>
    %80 = math.exp %79 : vector<8x8xf32>
    %cst_37 = arith.constant dense<0.000000e+00> : vector<8xf32>
    %81 = vector.multi_reduction <add>, %80, %cst_37 [1] : vector<8x8xf32> to vector<8xf32>
    %82 = vector.shape_cast %81 : vector<8xf32> to vector<8x1xf32>
    %83 = tpu.reciprocal %82 {approx = true} : vector<8x1xf32> -> vector<8x1xf32>
    %84 = vector.broadcast %83 : vector<8x1xf32> to vector<8x8xf32>
    %85 = arith.mulf %80, %84 : vector<8x8xf32>
    %86 = arith.truncf %85 : vector<8x8xf32> to vector<8x8xbf16>
    %87 = vector.extract_strided_slice %26 {offsets = [0, 16], sizes = [8, 8], strides = [1, 1]} : vector<8x32xbf16> to vector<8x8xbf16>
    %cst_38 = arith.constant dense<0.000000e+00> : vector<8x8xf32>
    %88 = tpu.matmul %86, %87, %cst_38 {dimension_numbers = #tpu.dot_dimension_numbers<[1], [0], [0], [1], [0, 0, 1, 1], [], []>} : vector<8x8xbf16>, vector<8x8xbf16>, vector<8x8xf32> -> vector<8x8xf32>
    %89 = arith.truncf %88 : vector<8x8xf32> to vector<8x8xbf16>
    %c2 = arith.constant 2 : index
    %c0_39 = arith.constant 0 : index
    %c0_40 = arith.constant 0 : index
    %90 = vector.load %arg9[%c2, %c0_39, %c0_40] : memref<4x8x32xbf16, #tpu.memory_space<vmem>>, vector<1x8x32xbf16>
    %91 = vector.shape_cast %90 : vector<1x8x32xbf16> to vector<8x32xbf16>
    %cst_41 = arith.constant dense<0.000000e+00> : vector<8x32xf32>
    %92 = tpu.matmul %89, %91, %cst_41 {dimension_numbers = #tpu.dot_dimension_numbers<[1], [0], [0], [1], [0, 0, 1, 1], [], []>} : vector<8x8xbf16>, vector<8x32xbf16>, vector<8x32xf32> -> vector<8x32xf32>
    %93 = arith.addf %71, %92 : vector<8x32xf32>
    %94 = vector.extract_strided_slice %18 {offsets = [0, 24], sizes = [8, 8], strides = [1, 1]} : vector<8x32xbf16> to vector<8x8xbf16>
    %95 = vector.extract_strided_slice %20 {offsets = [0, 24], sizes = [8, 8], strides = [1, 1]} : vector<8x32xbf16> to vector<8x8xbf16>
    %cst_42 = arith.constant dense<0.000000e+00> : vector<8x8xf32>
    %96 = tpu.matmul %94, %95, %cst_42 {dimension_numbers = #tpu.dot_dimension_numbers<[1], [1], [0], [0], [0, 0, 1, 0], [], []>} : vector<8x8xbf16>, vector<8x8xbf16>, vector<8x8xf32> -> vector<8x8xf32>
    %97 = arith.addf %96, %8 : vector<8x8xf32>
    %cst_43 = arith.constant dense<0xFF800000> : vector<8xf32>
    %98 = vector.multi_reduction <maximumf>, %97, %cst_43 [1] : vector<8x8xf32> to vector<8xf32>
    %99 = vector.shape_cast %98 : vector<8xf32> to vector<8x1xf32>
    %100 = vector.broadcast %99 : vector<8x1xf32> to vector<8x8xf32>
    %101 = arith.subf %97, %100 : vector<8x8xf32>
    %102 = math.exp %101 : vector<8x8xf32>
    %cst_44 = arith.constant dense<0.000000e+00> : vector<8xf32>
    %103 = vector.multi_reduction <add>, %102, %cst_44 [1] : vector<8x8xf32> to vector<8xf32>
    %104 = vector.shape_cast %103 : vector<8xf32> to vector<8x1xf32>
    %105 = tpu.reciprocal %104 {approx = true} : vector<8x1xf32> -> vector<8x1xf32>
    %106 = vector.broadcast %105 : vector<8x1xf32> to vector<8x8xf32>
    %107 = arith.mulf %102, %106 : vector<8x8xf32>
    %108 = arith.truncf %107 : vector<8x8xf32> to vector<8x8xbf16>
    %109 = vector.extract_strided_slice %26 {offsets = [0, 24], sizes = [8, 8], strides = [1, 1]} : vector<8x32xbf16> to vector<8x8xbf16>
    %cst_45 = arith.constant dense<0.000000e+00> : vector<8x8xf32>
    %110 = tpu.matmul %108, %109, %cst_45 {dimension_numbers = #tpu.dot_dimension_numbers<[1], [0], [0], [1], [0, 0, 1, 1], [], []>} : vector<8x8xbf16>, vector<8x8xbf16>, vector<8x8xf32> -> vector<8x8xf32>
    %111 = arith.truncf %110 : vector<8x8xf32> to vector<8x8xbf16>
    %c3 = arith.constant 3 : index
    %c0_46 = arith.constant 0 : index
    %c0_47 = arith.constant 0 : index
    %112 = vector.load %arg9[%c3, %c0_46, %c0_47] : memref<4x8x32xbf16, #tpu.memory_space<vmem>>, vector<1x8x32xbf16>
    %113 = vector.shape_cast %112 : vector<1x8x32xbf16> to vector<8x32xbf16>
    %cst_48 = arith.constant dense<0.000000e+00> : vector<8x32xf32>
    %114 = tpu.matmul %111, %113, %cst_48 {dimension_numbers = #tpu.dot_dimension_numbers<[1], [0], [0], [1], [0, 0, 1, 1], [], []>} : vector<8x8xbf16>, vector<8x32xbf16>, vector<8x32xf32> -> vector<8x32xf32>
    %115 = arith.addf %93, %114 : vector<8x32xf32>
    %c0_49 = arith.constant 0 : index
    %c0_50 = arith.constant 0 : index
    %116 = vector.load %arg10[%c0_49, %c0_50] : memref<1x32xf32, #tpu.memory_space<vmem>>, vector<1x32xf32>
    %117 = vector.broadcast %116 : vector<1x32xf32> to vector<8x32xf32>
    %118 = arith.addf %115, %117 : vector<8x32xf32>
    %119 = arith.addf %1, %118 : vector<8x32xf32>
    %cst_51 = arith.constant dense<0.000000e+00> : vector<8xf32>
    %120 = vector.multi_reduction <add>, %119, %cst_51 [1] : vector<8x32xf32> to vector<8xf32>
    %121 = vector.shape_cast %120 : vector<8xf32> to vector<8x1xf32>
    %cst_52 = arith.constant 3.200000e+01 : f32
    %122 = vector.broadcast %cst_52 : f32 to vector<8x1xf32>
    %123 = arith.divf %121, %122 : vector<8x1xf32>
    %124 = vector.broadcast %123 : vector<8x1xf32> to vector<8x32xf32>
    %125 = arith.subf %119, %124 : vector<8x32xf32>
    %126 = arith.mulf %125, %125 : vector<8x32xf32>
    %cst_53 = arith.constant dense<0.000000e+00> : vector<8xf32>
    %127 = vector.multi_reduction <add>, %126, %cst_53 [1] : vector<8x32xf32> to vector<8xf32>
    %128 = vector.shape_cast %127 : vector<8xf32> to vector<8x1xf32>
    %cst_54 = arith.constant 3.200000e+01 : f32
    %129 = vector.broadcast %cst_54 : f32 to vector<8x1xf32>
    %130 = arith.divf %128, %129 : vector<8x1xf32>
    %131 = vector.broadcast %123 : vector<8x1xf32> to vector<8x32xf32>
    %132 = arith.subf %119, %131 : vector<8x32xf32>
    %cst_55 = arith.constant 9.99999974E-6 : f32
    %133 = vector.broadcast %cst_55 : f32 to vector<8x1xf32>
    %134 = arith.addf %130, %133 : vector<8x1xf32>
    %135 = math.rsqrt %134 : vector<8x1xf32>
    %136 = vector.broadcast %135 : vector<8x1xf32> to vector<8x32xf32>
    %137 = arith.mulf %132, %136 : vector<8x32xf32>
    %c0_56 = arith.constant 0 : index
    %c0_57 = arith.constant 0 : index
    %138 = vector.load %arg15[%c0_56, %c0_57] : memref<1x32xf32, #tpu.memory_space<vmem>>, vector<1x32xf32>
    %139 = vector.broadcast %138 : vector<1x32xf32> to vector<8x32xf32>
    %140 = arith.mulf %137, %139 : vector<8x32xf32>
    %c0_58 = arith.constant 0 : index
    %c0_59 = arith.constant 0 : index
    %141 = vector.load %arg16[%c0_58, %c0_59] : memref<1x32xf32, #tpu.memory_space<vmem>>, vector<1x32xf32>
    %142 = vector.broadcast %141 : vector<1x32xf32> to vector<8x32xf32>
    %143 = arith.addf %140, %142 : vector<8x32xf32>
    %144 = arith.truncf %143 : vector<8x32xf32> to vector<8x32xbf16>
    %c0_60 = arith.constant 0 : index
    %c0_61 = arith.constant 0 : index
    %145 = vector.load %arg11[%c0_60, %c0_61] : memref<32x64xbf16, #tpu.memory_space<vmem>>, vector<32x64xbf16>
    %cst_62 = arith.constant dense<0.000000e+00> : vector<8x64xf32>
    %146 = tpu.matmul %144, %145, %cst_62 {dimension_numbers = #tpu.dot_dimension_numbers<[1], [0], [0], [1], [0, 0, 1, 1], [], []>} : vector<8x32xbf16>, vector<32x64xbf16>, vector<8x64xf32> -> vector<8x64xf32>
    %c0_63 = arith.constant 0 : index
    %c0_64 = arith.constant 0 : index
    %147 = vector.load %arg12[%c0_63, %c0_64] : memref<1x64xf32, #tpu.memory_space<vmem>>, vector<1x64xf32>
    %148 = vector.broadcast %147 : vector<1x64xf32> to vector<8x64xf32>
    %149 = arith.addf %146, %148 : vector<8x64xf32>
    %cst_65 = arith.constant 0.000000e+00 : f32
    %150 = vector.broadcast %cst_65 : f32 to vector<8x64xf32>
    %151 = arith.maximumf %149, %150 : vector<8x64xf32>
    %152 = arith.truncf %151 : vector<8x64xf32> to vector<8x64xbf16>
    %c0_66 = arith.constant 0 : index
    %c0_67 = arith.constant 0 : index
    %153 = vector.load %arg13[%c0_66, %c0_67] : memref<64x32xbf16, #tpu.memory_space<vmem>>, vector<64x32xbf16>
    %cst_68 = arith.constant dense<0.000000e+00> : vector<8x32xf32>
    %154 = tpu.matmul %152, %153, %cst_68 {dimension_numbers = #tpu.dot_dimension_numbers<[1], [0], [0], [1], [0, 0, 1, 1], [], []>} : vector<8x64xbf16>, vector<64x32xbf16>, vector<8x32xf32> -> vector<8x32xf32>
    %c0_69 = arith.constant 0 : index
    %c0_70 = arith.constant 0 : index
    %155 = vector.load %arg14[%c0_69, %c0_70] : memref<1x32xf32, #tpu.memory_space<vmem>>, vector<1x32xf32>
    %156 = vector.broadcast %155 : vector<1x32xf32> to vector<8x32xf32>
    %157 = arith.addf %154, %156 : vector<8x32xf32>
    %158 = arith.addf %143, %157 : vector<8x32xf32>
    %cst_71 = arith.constant dense<0.000000e+00> : vector<8xf32>
    %159 = vector.multi_reduction <add>, %158, %cst_71 [1] : vector<8x32xf32> to vector<8xf32>
    %160 = vector.shape_cast %159 : vector<8xf32> to vector<8x1xf32>
    %cst_72 = arith.constant 3.200000e+01 : f32
    %161 = vector.broadcast %cst_72 : f32 to vector<8x1xf32>
    %162 = arith.divf %160, %161 : vector<8x1xf32>
    %163 = vector.broadcast %162 : vector<8x1xf32> to vector<8x32xf32>
    %164 = arith.subf %158, %163 : vector<8x32xf32>
    %165 = arith.mulf %164, %164 : vector<8x32xf32>
    %cst_73 = arith.constant dense<0.000000e+00> : vector<8xf32>
    %166 = vector.multi_reduction <add>, %165, %cst_73 [1] : vector<8x32xf32> to vector<8xf32>
    %167 = vector.shape_cast %166 : vector<8xf32> to vector<8x1xf32>
    %cst_74 = arith.constant 3.200000e+01 : f32
    %168 = vector.broadcast %cst_74 : f32 to vector<8x1xf32>
    %169 = arith.divf %167, %168 : vector<8x1xf32>
    %170 = vector.broadcast %162 : vector<8x1xf32> to vector<8x32xf32>
    %171 = arith.subf %158, %170 : vector<8x32xf32>
    %cst_75 = arith.constant 9.99999974E-6 : f32
    %172 = vector.broadcast %cst_75 : f32 to vector<8x1xf32>
    %173 = arith.addf %169, %172 : vector<8x1xf32>
    %174 = math.rsqrt %173 : vector<8x1xf32>
    %175 = vector.broadcast %174 : vector<8x1xf32> to vector<8x32xf32>
    %176 = arith.mulf %171, %175 : vector<8x32xf32>
    %c0_76 = arith.constant 0 : index
    %c0_77 = arith.constant 0 : index
    %177 = vector.load %arg17[%c0_76, %c0_77] : memref<1x32xf32, #tpu.memory_space<vmem>>, vector<1x32xf32>
    %178 = vector.broadcast %177 : vector<1x32xf32> to vector<8x32xf32>
    %179 = arith.mulf %176, %178 : vector<8x32xf32>
    %c0_78 = arith.constant 0 : index
    %c0_79 = arith.constant 0 : index
    %180 = vector.load %arg18[%c0_78, %c0_79] : memref<1x32xf32, #tpu.memory_space<vmem>>, vector<1x32xf32>
    %181 = vector.broadcast %180 : vector<1x32xf32> to vector<8x32xf32>
    %182 = arith.addf %179, %181 : vector<8x32xf32>
    %c0_80 = arith.constant 0 : index
    %c0_81 = arith.constant 0 : index
    %c0_82 = arith.constant 0 : index
    %183 = vector.load %arg19[%c0_80, %c0_81, %c0_82] : memref<1x8x32xf32, #tpu.memory_space<vmem>>, vector<1x8x32xf32>
    %184 = vector.shape_cast %183 : vector<1x8x32xf32> to vector<8x32xf32>
    %185 = vector.shape_cast %182 : vector<8x32xf32> to vector<1x8x32xf32>
    tpu.vector_store %arg19[%c0_80, %c0_81, %c0_82], %185 {strides = array<i32>} : memref<1x8x32xf32, #tpu.memory_space<vmem>>, vector<1x8x32xf32>,
    return
  }
  func.func @transform_0(%arg0: i32) -> (i32, i32, i32) {
    %c0_i32 = arith.constant 0 : i32
    %c0_i32_0 = arith.constant 0 : i32
    %c0_i32_1 = arith.constant 0 : i32
    return %arg0, %c0_i32, %c0_i32_0 : i32, i32, i32
  }
  func.func @transform_1(%arg0: i32) -> (i32, i32, i32) {
    %c0_i32 = arith.constant 0 : i32
    %c0_i32_0 = arith.constant 0 : i32
    %c0_i32_1 = arith.constant 0 : i32
    return %arg0, %c0_i32, %c0_i32_0 : i32, i32, i32
  }
  func.func @transform_2(%arg0: i32) -> (i32, i32, i32) {
    %c0_i32 = arith.constant 0 : i32
    %c0_i32_0 = arith.constant 0 : i32
    %c0_i32_1 = arith.constant 0 : i32
    return %arg0, %c0_i32, %c0_i32_0 : i32, i32, i32
  }
  func.func @transform_3(%arg0: i32) -> (i32, i32) {
    %c0_i32 = arith.constant 0 : i32
    %c0_i32_0 = arith.constant 0 : i32
    %c0_i32_1 = arith.constant 0 : i32
    return %c0_i32, %c0_i32_0 : i32, i32
  }
  func.func @transform_4(%arg0: i32) -> (i32, i32) {
    %c0_i32 = arith.constant 0 : i32
    %c0_i32_0 = arith.constant 0 : i32
    %c0_i32_1 = arith.constant 0 : i32
    return %c0_i32, %c0_i32_0 : i32, i32
  }
  func.func @transform_5(%arg0: i32) -> (i32, i32) {
    %c0_i32 = arith.constant 0 : i32
    %c0_i32_0 = arith.constant 0 : i32
    %c0_i32_1 = arith.constant 0 : i32
    return %c0_i32, %c0_i32_0 : i32, i32
  }
  func.func @transform_6(%arg0: i32) -> (i32, i32) {
    %c0_i32 = arith.constant 0 : i32
    %c0_i32_0 = arith.constant 0 : i32
    %c0_i32_1 = arith.constant 0 : i32
    return %c0_i32, %c0_i32_0 : i32, i32
  }
  func.func @transform_7(%arg0: i32) -> (i32, i32) {
    %c0_i32 = arith.constant 0 : i32
    %c0_i32_0 = arith.constant 0 : i32
    %c0_i32_1 = arith.constant 0 : i32
    return %c0_i32, %c0_i32_0 : i32, i32
  }
  func.func @transform_8(%arg0: i32) -> (i32, i32, i32) {
    %c0_i32 = arith.constant 0 : i32
    %c0_i32_0 = arith.constant 0 : i32
    %c0_i32_1 = arith.constant 0 : i32
    %c0_i32_2 = arith.constant 0 : i32
    return %c0_i32, %c0_i32_0, %c0_i32_1 : i32, i32, i32
  }
  func.func @transform_9(%arg0: i32) -> (i32, i32) {
    %c0_i32 = arith.constant 0 : i32
    %c0_i32_0 = arith.constant 0 : i32
    %c0_i32_1 = arith.constant 0 : i32
    return %c0_i32, %c0_i32_0 : i32, i32
  }
  func.func @transform_10(%arg0: i32) -> (i32, i32) {
    %c0_i32 = arith.constant 0 : i32
    %c0_i32_0 = arith.constant 0 : i32
    %c0_i32_1 = arith.constant 0 : i32
    return %c0_i32, %c0_i32_0 : i32, i32
  }
  func.func @transform_11(%arg0: i32) -> (i32, i32) {
    %c0_i32 = arith.constant 0 : i32
    %c0_i32_0 = arith.constant 0 : i32
    %c0_i32_1 = arith.constant 0 : i32
    return %c0_i32, %c0_i32_0 : i32, i32
  }
  func.func @transform_12(%arg0: i32) -> (i32, i32) {
    %c0_i32 = arith.constant 0 : i32
    %c0_i32_0 = arith.constant 0 : i32
    %c0_i32_1 = arith.constant 0 : i32
    return %c0_i32, %c0_i32_0 : i32, i32
  }
  func.func @transform_13(%arg0: i32) -> (i32, i32) {
    %c0_i32 = arith.constant 0 : i32
    %c0_i32_0 = arith.constant 0 : i32
    %c0_i32_1 = arith.constant 0 : i32
    return %c0_i32, %c0_i32_0 : i32, i32
  }
  func.func @transform_14(%arg0: i32) -> (i32, i32) {
    %c0_i32 = arith.constant 0 : i32
    %c0_i32_0 = arith.constant 0 : i32
    %c0_i32_1 = arith.constant 0 : i32
    return %c0_i32, %c0_i32_0 : i32, i32
  }
  func.func @transform_15(%arg0: i32) -> (i32, i32) {
    %c0_i32 = arith.constant 0 : i32
    %c0_i32_0 = arith.constant 0 : i32
    %c0_i32_1 = arith.constant 0 : i32
    return %c0_i32, %c0_i32_0 : i32, i32
  }
  func.func @transform_16(%arg0: i32) -> (i32, i32) {
    %c0_i32 = arith.constant 0 : i32
    %c0_i32_0 = arith.constant 0 : i32
    %c0_i32_1 = arith.constant 0 : i32
    return %c0_i32, %c0_i32_0 : i32, i32
  }
  func.func @transform_17(%arg0: i32) -> (i32, i32) {
    %c0_i32 = arith.constant 0 : i32
    %c0_i32_0 = arith.constant 0 : i32
    %c0_i32_1 = arith.constant 0 : i32
    return %c0_i32, %c0_i32_0 : i32, i32
  }
  func.func @transform_18(%arg0: i32) -> (i32, i32, i32) {
    %c0_i32 = arith.constant 0 : i32
    %c0_i32_0 = arith.constant 0 : i32
    %c0_i32_1 = arith.constant 0 : i32
    return %arg0, %c0_i32, %c0_i32_0 : i32, i32, i32
  }
}

</mosaic_0001>

<bundles_post_ra>
// kernel: tpu_custom_call.1
= control target key start
LH: loop header
LB: loop body
LE: loop exit
PB: predicated region body
PF: predicated region fallthrough
CT: control target
= control target key end

     0   :  { %s3007_s0 = inlined_call_operand.vmem [shape: f32[2,8,32], index: 0, kind: input, shape index: {}]   ;;  %s3008_s1 = inlined_call_operand.vmem [shape: f32[2,8,32], index: 1, kind: input, shape index: {}]   ;;  %s3009_s2 = inlined_call_operand.hbm [shape: f32[2,1,8], index: 2, kind: input, shape index: {}]   ;;  %s3010_s3 = inlined_call_operand.hbm [shape: f32[8,8], index: 3, kind: input, shape index: {}]   ;;  %s3011_s4 = inlined_call_operand.vmem [shape: bf16[32,64], index: 4, kind: input, shape index: {}]   ;;  %s3012_s5 = inlined_call_operand.hbm [shape: f32[1,64], index: 5, kind: input, shape index: {}]   ;;  %s3013_s6 = inlined_call_operand.hbm [shape: bf16[32,32], index: 6, kind: input, shape index: {}]   ;;  %s3014_s7 = inlined_call_operand.hbm [shape: f32[1,32], index: 7, kind: input, shape index: {}]   ;;  %s3015_s8 = inlined_call_operand.hbm [shape: bf16[4,8,32], index: 8, kind: input, shape index: {}]   ;;  %s3016_s9 = inlined_call_operand.hbm [shape: f32[1,32], index: 9, kind: input, shape index: {}]   ;;  %s3017_s10 = inlined_call_operand.vmem [shape: bf16[32,64], index: 10, kind: input, shape index: {}]   ;;  %s3018_s11 = inlined_call_operand.vmem [shape: f32[1,64], index: 11, kind: input, shape index: {}]   ;;  %s3019_s12 = inlined_call_operand.vmem [shape: bf16[64,32], index: 12, kind: input, shape index: {}]   ;;  %s3020_s13 = inlined_call_operand.vmem [shape: f32[1,32], index: 13, kind: input, shape index: {}]   ;;  %s3021_s14 = inlined_call_operand.vmem [shape: f32[1,32], index: 14, kind: input, shape index: {}]   ;;  %s3022_s15 = inlined_call_operand.vmem [shape: f32[1,32], index: 15, kind: input, shape index: {}]   ;;  %s3023_s16 = inlined_call_operand.vmem [shape: f32[1,32], index: 16, kind: input, shape index: {}]   ;;  %s3024_s17 = inlined_call_operand.vmem [shape: f32[1,32], index: 17, kind: input, shape index: {}]   ;;  %s3025_s18 = inlined_call_operand.hbm [shape: f32[2,8,32], index: 18, kind: output, shape index: {}]  }
   0x1   :  { %3035 = sst [smem:[#allocation23_spill]] %s3007_s0 }
   0x2   :  { %3036 = sst [smem:[#allocation24_spill]] %s3008_s1 }
   0x3   :  { %3037 = sst [smem:[#allocation25_spill]] %s3009_s2 }
   0x4   :  { %3038 = sst [smem:[#allocation26_spill]] %s3010_s3 }
   0x5   :  { %3039 = sst [smem:[#allocation27_spill]] %s3012_s5 }
   0x6   :  { %3040 = sst [smem:[#allocation28_spill]] %s3013_s6 }
   0x7   :  { %3041 = sst [smem:[#allocation29_spill]] %s3014_s7 }
   0x8   :  { %3042 = sst [smem:[#allocation30_spill]] %s3015_s8 }
   0x9   :  { %3043 = sst [smem:[#allocation31_spill]] %s3016_s9 }
   0xa   :  { %3044 = sst [smem:[#allocation32_spill]] %s3024_s17 }
   0xb   :  { %3045 = sst [smem:[#allocation33_spill]] %s3025_s18 }
   0xc   :  { %23 = vsyncpa [#allocation3], 0 }
   0xd   :  { %25 = vsyncpa [#allocation3 + $0x1], 0 }
   0xe   :  { %26 = vsyncpa [#allocation6], 0 }
   0xf   :  { %27 = vsyncpa [#allocation9], 0 }
  0x10   :  { %28 = vsyncpa [#allocation12], 0 }
  0x11   :  { %29 = vsyncpa [#allocation4], 0 }
  0x12   :  { %31 = vsyncpa [#allocation4 + $0x1], 0  ;;  %s2602_s27 = smov 0   ;;  %s2604_s28 = smov 0  }
  0x13   :  { %s2606_s29 = smov 0   ;;  %s2608_s30 = smov 0  }
  0x14 LB: > { %3046 = sst [smem:[#allocation20_spill]] %s2482_s29  ;;  %s2488_s0 = smov [#allocation5]   ;;  %s2486_s30 = sphi %s2608_s30, %s3080_s30   ;;  %s2482_s29 = sphi %s2606_s29, %s3082_s29   ;;  %s2478_s28 = sphi %s2604_s28, %s3084_s28   ;;  %s2474_s27 = sphi %s2602_s27, %s3083_s27  }
  0x15   : > { %s474_s19 = sshll.u32 %s2488_s0, 4  ;;  %s2623_s1 = sadd.s32 4294967295, %s2486_s30   ;;  %s475_s19 = int_to_ptr.vmem [resolvable:$true] %s474_s19 }
  0x16   : > { %p1873_p0 = scmp.ge.s32.totalorder %s2486_s30, 1  ;;  %p3028_p1 = scmp.eq.s32.totalorder %s2623_s1, 0 }
  0x17   : > { %p461_p2 = scmp.lt.s32.totalorder %s2486_s30, 3  ;;  %s2489_s21 = smov [#allocation8]  }
  0x18   : > { %s498_s22 = sshll.u32 %s2489_s21, 4  ;;  %s2490_s23 = smov [#allocation11]   ;;  %s2635_s22 = int_to_ptr.vmem [resolvable:$true] %s498_s22 }
  0x19   : > { %p2628_p3 = pnand %p1873_p0, %p461_p2  ;;  %s522_s24 = sshll.u32 %s2490_s23, 4  ;;  %s2643_s24 = int_to_ptr.vmem [resolvable:$true] %s522_s24 }
  0x1a   : > { %s2237_s26 = scalar_lea.vmem %s475_s19, 128  ;;  %p2245_p11 = scmp.lt.s32.totalorder %s475_s19, %s475_s19 }
  0x1b   : > { %s3047_s20 = scalar_select %p2628_p3, 1, 0 }
  0x1c   : > { %p2106_p5 = pneg %p2628_p3  ;;  %p2238_p8 = scmp.ne.s32.totalorder %s475_s19, %s2237_s26 }
  0x1d   : > { %p2246_p12 = scmp.lt.s32.totalorder %s2237_s26, %s2237_s26 }
  0x1e   : > { %p2639_p6 = pnand %p2106_p5, %p3028_p1 }
  0x1f   : > { %p2247_p13 = por %p2246_p12, %p2245_p11 }
  0x20   : > { %p2647_p7 = pneg %p2639_p6 }
  0x22   : > { %p2240_p9 = pnand %p2238_p8, %p2647_p7 }
  0x24   : > { %p2241_p10 = pneg %p2240_p9 }
  0x26   : > { %p2248_p0 = pnand %p2247_p13, %p2241_p10 }
  0x28   : > { %2251 = shalt.err (!%p2248_p0)
}
  0x29   : > { %s3050_s3 = sld [smem:[#allocation26_spill]]  ;;  %s2263_s23 = scalar_lea.vmem %s2635_s22, 256 }
  0x2a   : > { %p2264_p2 = scmp.ne.s32.totalorder %s2635_s22, %s2263_s23  ;;  %p2271_p9 = scmp.lt.s32.totalorder %s2635_s22, %s2635_s22 }
  0x2b   : > { %p2272_p11 = scmp.lt.s32.totalorder %s2263_s23, %s2263_s23 }
  0x2c   : > { %p2266_p5 = pnand %p2264_p2, %p2647_p7 }
  0x2d   : > { %p2273_p10 = por %p2272_p11, %p2271_p9 }
  0x2e   : > { %p2267_p8 = pneg %p2266_p5 }
  0x2f   : > { %2109 = dma.hbm_to_vmem [thread:$0]  (!%p2639_p6), %s3050_s3, 128, %s475_s19, [#allocation6]  }
  0x30   : > { %p2274_p12 = pnand %p2273_p10, %p2267_p8 }
  0x32   : > { %2277 = shalt.err (!%p2274_p12)
}
  0x33   : > { %s2491_s26 = smov 64   ;;  %s2492_s0 = smov 4  }
  0x34   : > { %s3051_s6 = sld [smem:[#allocation28_spill]]  ;;  %s2289_s3 = scalar_lea.vmem %s2643_s24, 256 }
  0x35   : > { %p2290_p13 = scmp.ne.s32.totalorder %s2643_s24, %s2289_s3  ;;  %p2297_p5 = scmp.lt.s32.totalorder %s2643_s24, %s2643_s24 }
  0x36   : > { %p2298_p8 = scmp.lt.s32.totalorder %s2289_s3, %s2289_s3 }
  0x37   : > { %p2292_p0 = pnand %p2290_p13, %p2647_p7 }
  0x38   : > { %p2299_p9 = por %p2298_p8, %p2297_p5 }
  0x39   : > { %p2293_p2 = pneg %p2292_p0 }
  0x3a   : > { %2115 = dma.hbm_to_vmem [thread:$0]  (!%p2639_p6), %s3051_s6, 256, %s2635_s22, [#allocation9], %s2491_s26, %s2491_s26, %s2492_s0  }
  0x3b   : > { %p2300_p11 = pnand %p2299_p9, %p2293_p2 }
  0x3d   : > { %2303 = shalt.err (!%p2300_p11)
}
  0x3e   : > { %s3052_s8 = sld [smem:[#allocation30_spill]]  ;;  %s2493_s22 = smov [#allocation7]  }
  0x3f   : > { %s488_s19 = sshll.u32 %s2493_s22, 4  ;;  %s2494_s21 = smov [#allocation10]   ;;  %s489_s19 = int_to_ptr.vmem [resolvable:$true] %s488_s19 }
  0x40   : > { %s512_s6 = sshll.u32 %s2494_s21, 4  ;;  %s2315_s17 = scalar_lea.vmem %s489_s19, 16  ;;  %s513_s6 = int_to_ptr.vmem [resolvable:$true] %s512_s6 }
  0x41   : > { %p2316_p10 = scmp.ne.s32.totalorder %s489_s19, %s2315_s17  ;;  %s2322_s3 = scalar_lea.vmem %s489_s19, 32 }
  0x42   : > { %p2323_p0 = scmp.lt.s32.totalorder %s489_s19, %s489_s19  ;;  %p2324_p2 = scmp.lt.s32.totalorder %s2322_s3, %s2315_s17 }
  0x43   : > { %p2318_p12 = pnand %p2316_p10, %p2647_p7 }
  0x44   : > { %2121 = dma.hbm_to_vmem [thread:$0]  (!%p2639_p6), %s3052_s8, 256, %s2643_s24, [#allocation12], %s2491_s26, %s2491_s26, %s2492_s0  }
  0x45   : > { %p2319_p13 = pneg %p2318_p12  ;;  %p2325_p5 = por %p2324_p2, %p2323_p0 }
  0x47   : > { %p2326_p8 = pnand %p2325_p5, %p2319_p13 }
  0x49   : > { %2329 = shalt.err (!%p2326_p8)
}
  0x4a   : > { %s3053_s5 = sld [smem:[#allocation27_spill]]  ;;  %s2341_s26 = scalar_lea.vmem %s513_s6, 16 }
  0x4b   : > { %p2342_p9 = scmp.ne.s32.totalorder %s513_s6, %s2341_s26  ;;  %s2348_s0 = scalar_lea.vmem %s513_s6, 32 }
  0x4c   : > { %p2349_p12 = scmp.lt.s32.totalorder %s513_s6, %s513_s6  ;;  %p2350_p4 = scmp.lt.s32.totalorder %s2348_s0, %s2341_s26 }
  0x4d   : > { %p2344_p11 = pnand %p2342_p9, %p2647_p7 }
  0x4e   : > { %p2351_p1 = por %p2350_p4, %p2349_p12 }
  0x4f   : > { %p2345_p10 = pneg %p2344_p11 }
  0x50   : > { %2112 = dma.hbm_to_vmem [thread:$0]  (!%p2639_p6), %s3053_s5, 16, %s489_s19, [#allocation6]  }
  0x51   : > { %p2352_p0 = pnand %p2351_p1, %p2345_p10 }
  0x53   : > { %2355 = shalt.err (!%p2352_p0)
}
  0x54   : > { %s3054_s7 = sld [smem:[#allocation29_spill]]  ;;  %s2495_s22 = smov [#allocation13]  }
  0x55   : > { %s536_s19 = sshll.u32 %s2495_s22, 4  ;;  %s537_s19 = int_to_ptr.vmem [resolvable:$true] %s536_s19 }
  0x56   : > { %s2367_s21 = scalar_lea.vmem %s537_s19, 16  ;;  %s2374_s3 = scalar_lea.vmem %s537_s19, 32 }
  0x57   : > { %p2368_p13 = scmp.ne.s32.totalorder %s537_s19, %s2367_s21  ;;  %p2375_p8 = scmp.lt.s32.totalorder %s537_s19, %s537_s19 }
  0x58   : > { %p2376_p4 = scmp.lt.s32.totalorder %s2374_s3, %s2367_s21 }
  0x59   : > { %p2370_p2 = pnand %p2368_p13, %p2647_p7 }
  0x5a   : > { %2118 = dma.hbm_to_vmem [thread:$0]  (!%p2639_p6), %s3054_s7, 16, %s513_s6, [#allocation9]  }
  0x5b   : > { %p2371_p5 = pneg %p2370_p2  ;;  %p2377_p1 = por %p2376_p4, %p2375_p8 }
  0x5d   : > { %p2378_p9 = pnand %p2377_p1, %p2371_p5 }
  0x5f   : > { %2381 = shalt.err (!%p2378_p9)
}
  0x60   : > { %s3055_s9 = sld [smem:[#allocation31_spill]]  ;;  %s1872_s6 = sadd.s32 4294967294, %s2486_s30  }
  0x61   : > { %s2705_s2 = sadd.s32 1, %s2486_s30   ;;  %s96_s26 = sadd.s32 1, %s2482_s29 }
  0x62   : > { %3056 = sst [smem:[#allocation21_spill]] %s2705_s2  ;;  %s93_s25 = ssub.s32 %s2486_s30, %s2705_s2 }
  0x63   : > { %p94_p7 = scmp.eq.s32.totalorder %s93_s25, 0  ;;  %p103_p11 = scmp.ne.s32.totalorder %s2482_s29, %s2478_s28 }
  0x64   : > { %p104_p10 = scmp.eq.s32.totalorder %s2486_s30, 0  ;;  %p109_p12 = scmp.ne.s32.totalorder %s2478_s28, %s2474_s27 }
  0x65   : > { %s2716_s0 = scalar_select %p94_p7, %s2482_s29, %s96_s26  }
  0x66   : > { %2124 = dma.hbm_to_vmem [thread:$0]  (!%p2639_p6), %s3055_s9, 16, %s537_s19, [#allocation12]  }
  0x67   : > { %3057 = sst [smem:[#allocation22_spill]] %s2716_s0  ;;  %p2718_p0 = por %p104_p10, %p103_p11 }
  0x68   : > { %p3059_p13 = scmp.eq.s32.totalorder %s2623_s1, 0  ;;  %p448_p2 = scmp.eq.s32.totalorder %s2623_s1, 1 }
  0x69   : > { %p454_p5 = scmp.eq.s32.totalorder %s1872_s6, 1  ;;  %p2139_p8 = scmp.lt.s32.totalorder %s2486_s30, 2 }
  0x6a   : > { %p2724_p6 = por %p3059_p13, %p109_p12  ;;  %s585_s22 = sand.u32 1, %s2482_s29  }
  0x6b   : > { %p2731_p4 = por %p448_p2, %p103_p11  ;;  %p2735_p1 = por %p454_p5, %p109_p12 }
  0x6c   : > { %s3060_s23 = scalar_select %p2724_p6, 1, 0 }
  0x6d   : > { %s3061_s19 = scalar_select %p2731_p4, 1, 0 }
  0x6e   : > { %s3062_s21 = scalar_select %p2735_p1, 1, 0 }
  0x6f   : > { %s1881_s3 = sshll.u32 %s2486_s30, 4  ;;  %s588_s18 = scalar_lea.vmem [#allocation2], %s585_s22 }
  0x70   : > { %s595_s24 = sshll.u32 %s588_s18, 4  ;;  %s3063_s5 = sld [smem:[#allocation25_spill]]  ;;  %s596_s24 = int_to_ptr.vmem [resolvable:$true] %s595_s24 }
  0x71   : > { %p2747_p9 = pnand %p2139_p8, %p2718_p0  ;;  %s586_s8 = scalar_lea.sflag [#allocation3], %s585_s22 }
  0x73   : > { %p2384_p11 = pneg %p2747_p9 }
  0x76   : > { %s2743_s7 = scalar_lea.hbm %s3063_s5, %s1881_s3  ;;  %s2387_s25 = scalar_lea.hbm %s3063_s5, 32 }
  0x77   : > { %s2382_s9 = scalar_lea.hbm %s2743_s7, 16  ;;  %p2388_p13 = scmp.lt.s32.totalorder %s2743_s7, %s3063_s5 }
  0x78   : > { %p2383_p7 = scmp.ne.s32.totalorder %s2743_s7, %s2382_s9  ;;  %p2389_p0 = scmp.lt.s32.totalorder %s2387_s25, %s2382_s9 }
  0x7a   : > { %p2385_p10 = pnand %p2384_p11, %p2383_p7  ;;  %p2390_p2 = por %p2389_p0, %p2388_p13 }
  0x7c   : > { %p2386_p12 = pneg %p2385_p10 }
  0x7e   : > { %p2391_p5 = pnand %p2390_p2, %p2386_p12 }
  0x80   : > { %2394 = shalt.err (!%p2391_p5)
}
  0x81   : > { %s2395_s17 = scalar_lea.vmem %s596_s24, 16  ;;  %s2496_s22 = smov [#allocation2]  }
  0x82   : > { %p2396_p8 = scmp.ne.s32.totalorder %s596_s24, %s2395_s17  ;;  %s2400_s29 = sshll.u32 %s2496_s22, 4  ;;  %s2401_s29 = int_to_ptr.vmem [resolvable:$false] %s2400_s29 }
  0x83   : > { %s2402_s2 = scalar_lea.vmem %s2401_s29, 32  ;;  %p2403_p7 = scmp.lt.s32.totalorder %s596_s24, %s2401_s29 }
  0x84   : > { %p2398_p1 = pnand %p2396_p8, %p2384_p11  ;;  %p2404_p10 = scmp.lt.s32.totalorder %s2402_s2, %s2395_s17 }
  0x86   : > { %p2399_p4 = pneg %p2398_p1  ;;  %p2405_p6 = por %p2404_p10, %p2403_p7 }
  0x88   : > { %p2406_p3 = pnand %p2405_p6, %p2399_p4 }
  0x8a   : > { %2409 = shalt.err (!%p2406_p3)
}
  0x8b   : > { %2128 = dma.hbm_to_vmem [thread:$0]  (!%p2747_p9), %s2743_s7, 16, %s596_s24, %s586_s8  }
  0x8c   : > { %p3065_p12 = scmp.ne.s32.totalorder %s3047_s20, 0 }
  0x8d   : > { %s2768_s9 = sand.u32 (!%p3065_p12), 1, %s2478_s28   ;;  %p3066_p1 = scmp.ne.s32.totalorder (!%p3065_p12), %s3060_s23, 0 }
  0x8e   : > { %604 = sbr.rel (%p3065_p12) target bundleno = 3657 (0xe49), region = 92  ;;  %s607_s0 = scalar_lea.sflag (!%p3065_p12), [#allocation3], %s2768_s9 }
  0x8f   : > { %s609_s18 = scalar_lea.vmem (!%p3065_p12), [#allocation2], %s2768_s9 }
  0x93   : > { %2453 = dma.done.wait (%p3066_p1), %s607_s0, 16  }
  0x94   : > { %2455 = vsyncadd (%p3066_p1), %s607_s0, 4294967280  ;;  %p3067_p3 = scmp.eq.s32.totalorder %s2623_s1, 0 }
  0x96   : > { %2457 = dma.done.wait (%p3067_p3), [#allocation6], 144   ;;  %p3068_p6 = pmov %p3067_p3 }
  0x97   : > { %p3069_p4 = pmov %p3067_p3 }
  0x98   : > { %2459 = vsyncadd (%p3068_p6), [#allocation6], 4294967152 }
  0x99   : > { %2461 = dma.done.wait (%p3069_p4), [#allocation9], 272   ;;  %p3070_p9 = pmov %p3067_p3 }
  0x9a   : > { %p3071_p11 = pmov %p3067_p3 }
  0x9b   : > { %2463 = vsyncadd (%p3070_p9), [#allocation9], 4294967024 }
  0x9c   : > { %2465 = dma.done.wait (%p3071_p11), [#allocation12], 272   ;;  %p3072_p13 = pmov %p3067_p3 }
  0x9d   : > { %p693_p0 = scmp.lt.s32.totalorder %s2623_s1, 1  ;;  %v2497_v0 = vmov 0.0   ;;  %vm2498_vm0 = vmmov 0   ;;  %s3073_s2 = sld [smem:[#allocation23_spill]]  ;;  %v2196_v1 = vld [vmem:[%s3011_s4 + $0x8] sm:$0xff]   ;;  %v2197_v2 = vld [vmem:[%s3011_s4] sm:$0xff]  }
  0x9e   : > { %2467 = vsyncadd (%p3072_p13), [#allocation12], 4294967024  ;;  %1970 = vmatprep.subr.bf16.mxu0 %v2497_v0  ;;  %1974 = vmatprep.mubr.msk.bf16.mxu0 %vm2498_vm0, %v2497_v0  ;;  %s3074_s3 = sld [smem:[#allocation24_spill]]  ;;  %vm739_vm1 = vcmask 261120   ;;  %v1893_v7 = vld [vmem:[#allocation7] ss:$0 sm:$0xff] }
  0x9f   : > { %s694_s7 = scalar_select %p693_p0, %s2623_s1, 1  ;;  %1978 = vmatprep.subr.bf16.mxu1 %v2497_v0  ;;  %1982 = vmatprep.mubr.msk.bf16.mxu1 %vm2498_vm0, %v2497_v0  ;;  %v2198_v14 = vld [vmem:[#allocation8 + $0x8] sm:$0xff]   ;;  %v2199_v15 = vld [vmem:[#allocation8] sm:$0xff]   ;;  %vm854_vm2 = vcmask 64512   ;;  %v1892_v22 = vld [vmem:[%s609_s18] ss:$0 sm:$0xff] }
  0xa0   : > { %1971 = vmatpush3.bf16.msra.mxu0 %v2196_v1  ;;  %s2501_s29 = smov 88   ;;  %1979 = vmatpush3.bf16.msra.mxu1 %v2198_v14  ;;  %v705_v23 = vld [vmem:[#allocation5] sm:$0xff]  ;;  %v1897_v37 = vld [vmem:[#allocation10] ss:$0 sm:$0xff]  ;;  %vm916_vm3 = vcmask 1043456   ;;  %s2502_s18 = smov 80  }
  0xa1   : > { %s1890_s8 = sshll.u32 %s694_s7, 3  ;;  %1972 = vmatprep.subr.bf16.mxu0 %v2497_v0  ;;  %s2499_s7 = smov 120   ;;  %1980 = vmatprep.subr.bf16.mxu1 %v2497_v0  ;;  %v2842_v24 = vadd.f32 %v1892_v22, %v705_v23  ;;  %vm1635_vm4 = vcmask 523264  }
  0xa2   : > { %s2503_s20 = smov 112   ;;  %s1889_s17 = sshll.u32 %s2768_s9, 3 }
  0xa3   : > { %s696_s23 = scalar_lea.vmem %s3073_s2, %s1890_s8  ;;  %s2504_s2 = smov 104  }
  0xa4   : > { %s700_s25 = scalar_lea.vmem %s3074_s3, %s1890_s8  ;;  %v2808_v3 = vld [vmem:[%s696_s23] sm:$0xff]  ;;  %1973 = vmatpush3.bf16.msra.mxu0 %v2197_v2  ;;  %s2500_s8 = smov 96   ;;  %1981 = vmatpush3.bf16.msra.mxu1 %v2199_v15 }
  0xa5   : > { %v703_v4 = vld [vmem:[%s700_s25] sm:$0xff]  ;;  %1986 = vmatprep.subr.bf16.mxu0 %v2497_v0  ;;  %v715_v16 = vpack.c.bf16 %v2808_v3, %v2808_v3  ;;  %1992 = vmatprep.subr.bf16.mxu1 %v2497_v0  ;;  %s2505_s23 = smov 72   ;;  %s3076_s6 = sld [smem:[#allocation33_spill]] }
  0xa6   : > { %v713_v5 = vadd.f32 %v703_v4, %v2808_v3  ;;  %v961_v2 = vld [vmem:[#allocation11] sm:$0xf]  ;;  %s1711_s25 = scalar_lea.sflag [#allocation4], %s2768_s9  ;;  %p3077_p5 = scmp.ne.s32.totalorder %s3061_s19, 0 }
  0xa7   : > { %1983 = vmatmul.mubr.msk.bf16.vlgmr.msra.gmra.mxu1 %vm739_vm1, %v715_v16  ;;  %v1126_v4 = vsel %vm916_vm3, %v961_v2, 0  ;;  %s2506_s22 = smov [#allocation14]  }
  0xa8   : > { %v714_v6 = vpack.c.bf16 %v713_v5, %v713_v5  ;;  %1994 = vmatprep.mubr.msk.bf16.mxu1 %vm2498_vm0, %v2497_v0  ;;  %v1075_v5 = vld [vmem:[#allocation11 + $0x4] sm:$0xf]  ;;  %s2414_s0 = sshll.u32 %s2506_s22, 4  ;;  %s2415_s0 = int_to_ptr.vmem [resolvable:$false] %s2414_s0 }
  0xaa   : > { %1975 = vmatmul.mubr.msk.bf16.vlgmr.msra.gmra.mxu0 %vm739_vm1, %v714_v6  ;;  %v1080_v6 = vsel %vm916_vm3, %v1075_v5, 0 }
  0xab   : > { %1988 = vmatprep.mubr.msk.bf16.mxu0 %vm2498_vm0, %v2497_v0 }
 0x167   : > { %v844_v38 = vpop.f32.mrf.mxu1 }
 0x168   : > { %v845_v39 = vadd.f32 %v1897_v37, %v844_v38 }
 0x169   : > { %v1984_v40 = vpop.f32.mrf.mxu1 }
 0x16a   : > { %v777_v8 = vpop.f32.mrf.mxu0  ;;  %v2848_v41 = vpack.c.bf16 %v845_v39, %v845_v39 }
 0x16b   : > { %v778_v9 = vadd.f32 %v1893_v7, %v777_v8  ;;  %v847_v42 = vpop.f32.mrf.mxu1 }
 0x16c   : > { %v1976_v10 = vpop.f32.mrf.mxu0  ;;  %v918_v43 = vsel %vm916_vm3, %v2848_v41, 0 }
 0x16d   : > { %v2816_v11 = vpack.c.bf16 %v778_v9, %v778_v9  ;;  %v1985_v44 = vpop.f32.mrf.mxu1  ;;  %1993 = vmatpush3.bf16.msra.mxu1 %v918_v43 }
 0x16e   : > { %v780_v12 = vpop.f32.mrf.mxu0  ;;  %2004 = vmatprep.subr.bf16.mxu1 %v2497_v0 }
 0x16f   : > { %962 = vrot.lane.b32.xlu1 %v2816_v11, %s2499_s7  ;;  %852 = vrot.lane.b32.xlu0 %v2816_v11, %s2500_s8 }
 0x170   : > { %v1977_v13 = vpop.f32.mrf.mxu0 }
 0x173   : > { %964 = vrot.lane.b32.xlu0 %v2816_v11, %s2501_s29  ;;  %s3075_s29 = sld [smem:[#allocation32_spill]] }
 0x1e1   : > { %v853_v17 = vpop.permute.xlu0 %852  ;;  %v963_v21 = vpop.permute.xlu1 %962 }
 0x1e2   : > { %v859_v18 = vsel %vm854_vm2, %v853_v17, 0 }
 0x1e3   : > { %1987 = vmatpush3.bf16.xpose.msra.mxu0 %v859_v18 }
 0x1e4   : > { %1998 = vmatprep.subr.bf16.mxu0 %v2497_v0 }
 0x1e5   : > { %v965_v19 = vpop.permute.xlu0 %964 }
 0x1e6   : > { %v970_v20 = vsel %vm854_vm2, %v965_v19, 0 }
 0x1ea   : > { %1989 = vmatmul.mubr.msk.bf16.vlgmr.msra.gmra.mxu0 %vm854_vm2, %v2816_v11 }
 0x1eb   : > { %1999 = vmatpush3.bf16.xpose.msra.mxu0 %v970_v20  ;;  %2000 = vmatprep.mubr.msk.bf16.mxu0 %vm2498_vm0, %v2497_v0 }
 0x1ec   : > { %2010 = vmatprep.subr.bf16.mxu0 %v2497_v0 }
 0x1f2   : > { %2001 = vmatmul.mubr.msk.bf16.vlgmr.msra.gmra.mxu0 %vm854_vm2, %v963_v21 }
 0x1f3   : > { %2012 = vmatprep.mubr.msk.bf16.mxu0 %vm2498_vm0, %v2497_v0  ;;  %2011 = vmatpush3.bf16.msra.mxu0 %v1080_v6 }
 0x1f4   : > { %2022 = vmatprep.subr.bf16.mxu0 %v2497_v0 }
 0x2aa   : > { %v895_v25 = vpop.f32.mrf.mxu0 }
 0x2ab   : > { %v896_v26 = vadd.f32 %v895_v25, %v2842_v24 }
 0x2ac   : > { %v1990_v27 = vpop.f32.mrf.mxu0 }
 0x2ad   : > { %v901_v28 = vsel %vm854_vm2, %v896_v26, -inf }
 0x2ae   : > { %902 = vmax.xlane.f32.xlu1 %v901_v28  ;;  %v898_v29 = vpop.f32.mrf.mxu0 }
 0x2b0   : > { %v1991_v30 = vpop.f32.mrf.mxu0 }
 0x2b2   : > { %v1006_v31 = vpop.f32.mrf.mxu0 }
 0x2b3   : > { %v1007_v32 = vadd.f32 %v1006_v31, %v2842_v24 }
 0x2b4   : > { %v2002_v33 = vpop.f32.mrf.mxu0 }
 0x2b5   : > { %v1012_v34 = vsel %vm854_vm2, %v1007_v32, -inf }
 0x2b6   : > { %1013 = vmax.xlane.f32.xlu0 %v1012_v34  ;;  %v1009_v35 = vpop.f32.mrf.mxu0 }
 0x2b8   : > { %v2003_v36 = vpop.f32.mrf.mxu0 }
 0x337   : > { %v903_v45 = vpop.xlane.xlu1 %902 }
 0x338   : > { %v904_v46 = vsub.f32 %v896_v26, %v903_v45 }
 0x33a   : > { %v905_v47 = vmul.f32 1.442695, %v904_v46 }
 0x33c   : > { %2206 = vpow2.f32 %v905_v47 }
 0x33f   : > { %v1014_v48 = vpop.xlane.xlu0 %1013 }
 0x340   : > { %v1015_v49 = vsub.f32 %v1007_v32, %v1014_v48 }
 0x342   : > { %v1016_v50 = vmul.f32 1.442695, %v1015_v49 }
 0x344   : > { %2208 = vpow2.f32 %v1016_v50 }
 0x349   : > { %v2207_v51 = vpop.eup %2206 }
 0x34a   : > { %v907_v52 = vsel %vm854_vm2, %v2207_v51, 0.0 }
 0x34b   : > { %908 = vadd.xlane.f32.xlu0 %v907_v52 }
 0x351   : > { %v2209_v53 = vpop.eup %2208 }
 0x352   : > { %v1018_v54 = vsel %vm854_vm2, %v2209_v53, 0.0 }
 0x353   : > { %1019 = vadd.xlane.f32.xlu1 %v1018_v54 }
 0x361   : > { %1025 = vrot.lane.b32.xlu0 %v2848_v41, %s2499_s7 }
 0x364   : > { %1170 = vrot.lane.b32.xlu1 %v2816_v11, %s2502_s18  ;;  %s1929_s18 = sshll.u32 %s2623_s1, 7  ;;  %s2416_s1 = scalar_lea.vmem %s2415_s0, 256 }
 0x365   : > { %s1722_s3 = scalar_lea.hbm %s3076_s6, %s1929_s18 }
 0x368   : > { %1168 = vrot.lane.b32.xlu1 %v2816_v11, %s2503_s20 }
 0x3d4   : > { %v909_v55 = vpop.xlane.xlu0 %908 }
 0x3d5   : > { %2210 = vrcp.f32 %v909_v55 }
 0x3d8   : > { %v1026_v58 = vpop.permute.xlu0 %1025 }
 0x3d9   : > { %v1031_v60 = vsel %vm916_vm3, %v1026_v58, 0 }
 0x3dc   : > { %v1020_v56 = vpop.xlane.xlu1 %1019 }
 0x3dd   : > { %2212 = vrcp.f32 %v1020_v56 }
 0x3e0   : > { %v1171_v13 = vpop.permute.xlu1 %1170 }
 0x3e1   : > { %v1176_v17 = vsel %vm854_vm2, %v1171_v13, 0 }
 0x3e2   : > { %v2211_v57 = vpop.eup %2210 }
 0x3e3   : > { %v911_v59 = vmul.f32 %v2211_v57, %v2207_v51 }
 0x3e4   : > { %v1169_v20 = vpop.permute.xlu1 %1168 }
 0x3e5   : > { %v912_v61 = vpack.c.bf16 %v911_v59, %v911_v59 }
 0x3e7   : > { %1995 = vmatmul.mubr.msk.bf16.vlgmr.msra.gmra.mxu1 %vm854_vm2, %v912_v61 }
 0x3e8   : > { %2005 = vmatpush3.bf16.msra.mxu1 %v1031_v60  ;;  %2006 = vmatprep.mubr.msk.bf16.mxu1 %vm2498_vm0, %v2497_v0 }
 0x3e9   : > { %2016 = vmatprep.subr.bf16.mxu1 %v2497_v0 }
 0x3ea   : > { %v2213_v62 = vpop.eup %2212 }
 0x3eb   : > { %v1022_v63 = vmul.f32 %v2213_v62, %v2209_v53 }
 0x3ed   : > { %v1023_v1 = vpack.c.bf16 %v1022_v63, %v1022_v63 }
 0x3ef   : > { %2007 = vmatmul.mubr.msk.bf16.vlgmr.msra.gmra.mxu1 %vm854_vm2, %v1023_v1 }
 0x3f0   : > { %2018 = vmatprep.mubr.msk.bf16.mxu1 %vm2498_vm0, %v2497_v0  ;;  %2017 = vmatpush3.bf16.msra.mxu1 %v1126_v4 }
 0x3f1   : > { %2028 = vmatprep.subr.bf16.mxu1 %v2497_v0 }
 0x4a7   : > { %v954_v7 = vpop.f32.mrf.mxu1 }
 0x4a8   : > { %v960_v8 = vpack.c.bf16 %v954_v7, %v954_v7 }
 0x4a9   : > { %v1996_v9 = vpop.f32.mrf.mxu1 }
 0x4aa   : > { %2019 = vmatmul.mubr.msk.bf16.vlgmr.msra.gmra.mxu1 %vm854_vm2, %v960_v8  ;;  %v1440_v9 = vld [vmem:[#allocation11 + $0xc] sm:$0xf] }
 0x4ab   : > { %v957_v10 = vpop.f32.mrf.mxu1  ;;  %2030 = vmatprep.mubr.msk.bf16.mxu1 %vm2498_vm0, %v2497_v0 }
 0x4ac   : > { %v1445_v10 = vsel %vm916_vm3, %v1440_v9, 0 }
 0x4ad   : > { %v1997_v12 = vpop.f32.mrf.mxu1 }
 0x4af   : > { %v1067_v14 = vpop.f32.mrf.mxu1 }
 0x4b0   : > { %v1073_v15 = vpack.c.bf16 %v1067_v14, %v1067_v14 }
 0x4b1   : > { %v2008_v16 = vpop.f32.mrf.mxu1 }
 0x4b2   : > { %2013 = vmatmul.mubr.msk.bf16.vlgmr.msra.gmra.mxu0 %vm854_vm2, %v1073_v15 }
 0x4b3   : > { %2023 = vmatpush3.bf16.xpose.msra.mxu0 %v1176_v17  ;;  %v1070_v18 = vpop.f32.mrf.mxu1  ;;  %2024 = vmatprep.mubr.msk.bf16.mxu0 %vm2498_vm0, %v2497_v0 }
 0x4b4   : > { %2034 = vmatprep.subr.bf16.mxu0 %v2497_v0 }
 0x4b5   : > { %v2009_v19 = vpop.f32.mrf.mxu1 }
 0x4ba   : > { %2025 = vmatmul.mubr.msk.bf16.vlgmr.msra.gmra.mxu0 %vm854_vm2, %v1169_v20 }
 0x4bb   : > { %2036 = vmatprep.mubr.msk.bf16.mxu0 %vm2498_vm0, %v2497_v0 }
 0x56a   : > { %v1162_v21 = vpop.f32.mrf.mxu1 }
 0x56c   : > { %v2020_v22 = vpop.f32.mrf.mxu1 }
 0x56e   : > { %v1165_v23 = vpop.f32.mrf.mxu1 }
 0x570   : > { %v2021_v25 = vpop.f32.mrf.mxu1 }
 0x572   : > { %v1116_v26 = vpop.f32.mrf.mxu0 }
 0x573   : > { %v2883_v27 = vadd.f32 %v1162_v21, %v1116_v26  ;;  %v1913_v26 = vld [vmem:[#allocation13] ss:$0 sm:$0xff] }
 0x574   : > { %v2014_v28 = vpop.f32.mrf.mxu0 }
 0x576   : > { %v1119_v29 = vpop.f32.mrf.mxu0 }
 0x578   : > { %v2015_v30 = vpop.f32.mrf.mxu0 }
 0x57a   : > { %v1212_v31 = vpop.f32.mrf.mxu0 }
 0x57b   : > { %v1213_v32 = vadd.f32 %v1212_v31, %v2842_v24 }
 0x57c   : > { %v2026_v33 = vpop.f32.mrf.mxu0 }
 0x57d   : > { %v1218_v34 = vsel %vm854_vm2, %v1213_v32, -inf }
 0x57e   : > { %1219 = vmax.xlane.f32.xlu0 %v1218_v34  ;;  %v1215_v35 = vpop.f32.mrf.mxu0 }
 0x580   : > { %v2027_v36 = vpop.f32.mrf.mxu0 }
 0x594   : > { %1230 = vrot.lane.b32.xlu0 %v2848_v41, %s2503_s20  ;;  %s692_s20 = scalar_lea.vmem [#allocation14], %s1889_s17 }
 0x598   : > { %1328 = vrot.lane.b32.xlu0 %v2816_v11, %s2504_s2 }
 0x607   : > { %v1220_v37 = vpop.xlane.xlu0 %1219 }
 0x608   : > { %v1221_v38 = vsub.f32 %v1213_v32, %v1220_v37 }
 0x60a   : > { %v1222_v39 = vmul.f32 1.442695, %v1221_v38 }
 0x60b   : > { %v1231_v40 = vpop.permute.xlu0 %1230 }
 0x60c   : > { %2214 = vpow2.f32 %v1222_v39  ;;  %v1236_v42 = vsel %vm916_vm3, %v1231_v40, 0  ;;  %v2200_v39 = vld [vmem:[%s3017_s10 + $0x8] sm:$0xff]   ;;  %v2202_v40 = vld [vmem:[%s3019_s12 + $0x18] sm:$0xff]  }
 0x60d   : > { %2029 = vmatpush3.bf16.msra.mxu1 %v1236_v42  ;;  %v2203_v42 = vld [vmem:[%s3019_s12 + $0x10] sm:$0xff]  }
 0x60e   : > { %2040 = vmatprep.subr.bf16.mxu1 %v2497_v0 }
 0x60f   : > { %v1329_v51 = vpop.permute.xlu0 %1328 }
 0x619   : > { %v2215_v43 = vpop.eup %2214 }
 0x61a   : > { %v1224_v44 = vsel %vm854_vm2, %v2215_v43, 0.0 }
 0x61b   : > { %1225 = vadd.xlane.f32.xlu1 %v1224_v44 }
 0x62c   : > { %1330 = vrot.lane.b32.xlu1 %v2816_v11, %s2505_s23  ;;  %v1280_v11 = vld [vmem:[#allocation11 + $0x8] sm:$0xf] }
 0x62d   : > { %v1285_v52 = vsel %vm916_vm3, %v1280_v11, 0 }
 0x62e   : > { %2035 = vmatpush3.bf16.msra.mxu0 %v1285_v52  ;;  %v2204_v52 = vld [vmem:[%s3019_s12 + $0x8] sm:$0xff]  }
 0x62f   : > { %2046 = vmatprep.subr.bf16.mxu0 %v2497_v0 }
 0x6a4   : > { %v1226_v45 = vpop.xlane.xlu1 %1225 }
 0x6a5   : > { %2216 = vrcp.f32 %v1226_v45 }
 0x6a8   : > { %v1331_v48 = vpop.permute.xlu1 %1330 }
 0x6a9   : > { %v1336_v50 = vsel %vm854_vm2, %v1331_v48, 0 }
 0x6b2   : > { %v2217_v46 = vpop.eup %2216 }
 0x6b3   : > { %v1228_v47 = vmul.f32 %v2217_v46, %v2215_v43 }
 0x6b5   : > { %v1229_v49 = vpack.c.bf16 %v1228_v47, %v1228_v47  ;;  %v1914_v47 = vld [vmem:[%s3021_s14] ss:$0 sm:$0xff] }
 0x6b7   : > { %2031 = vmatmul.mubr.msk.bf16.vlgmr.msra.gmra.mxu1 %vm854_vm2, %v1229_v49  ;;  %v1915_v49 = vld [vmem:[%s3022_s15] ss:$0 sm:$0xff] }
 0x6b8   : > { %2041 = vmatpush3.bf16.xpose.msra.mxu1 %v1336_v50  ;;  %2042 = vmatprep.mubr.msk.bf16.mxu1 %vm2498_vm0, %v2497_v0 }
 0x6b9   : > { %2052 = vmatprep.subr.bf16.mxu1 %v2497_v0 }
 0x6bf   : > { %2043 = vmatmul.mubr.msk.bf16.vlgmr.msra.gmra.mxu1 %vm854_vm2, %v1329_v51 }
 0x6c0   : > { %2054 = vmatprep.mubr.msk.bf16.mxu1 %vm2498_vm0, %v2497_v0  ;;  %2053 = vmatpush3.bf16.msra.mxu1 %v1445_v10 }
 0x6c1   : > { %2066 = vmatprep.subr.bf16.mxu1 %v2497_v0 }
 0x777   : > { %v1272_v53 = vpop.f32.mrf.mxu1 }
 0x778   : > { %v1278_v54 = vpack.c.bf16 %v1272_v53, %v1272_v53  ;;  %v2205_v53 = vld [vmem:[%s3019_s12] sm:$0xff]  }
 0x779   : > { %v2032_v55 = vpop.f32.mrf.mxu1 }
 0x77a   : > { %2037 = vmatmul.mubr.msk.bf16.vlgmr.msra.gmra.mxu0 %vm854_vm2, %v1278_v54  ;;  %v1916_v54 = vld [vmem:[%s3018_s11] ss:$0 sm:$0xff] }
 0x77b   : > { %v1275_v56 = vpop.f32.mrf.mxu1  ;;  %2048 = vmatprep.mubr.msk.bf16.mxu0 %vm2498_vm0, %v2497_v0 }
 0x77d   : > { %v2033_v57 = vpop.f32.mrf.mxu1 }
 0x77f   : > { %v1372_v58 = vpop.f32.mrf.mxu1 }
 0x780   : > { %v1373_v59 = vadd.f32 %v1372_v58, %v2842_v24 }
 0x781   : > { %v2044_v60 = vpop.f32.mrf.mxu1 }
 0x782   : > { %v1378_v61 = vsel %vm854_vm2, %v1373_v59, -inf }
 0x783   : > { %1379 = vmax.xlane.f32.xlu1 %v1378_v61  ;;  %v1375_v62 = vpop.f32.mrf.mxu1 }
 0x785   : > { %v2045_v63 = vpop.f32.mrf.mxu1 }
 0x80c   : > { %v1380_v1 = vpop.xlane.xlu1 %1379 }
 0x80d   : > { %v1381_v2 = vsub.f32 %v1373_v59, %v1380_v1 }
 0x80f   : > { %v1382_v4 = vmul.f32 1.442695, %v1381_v2 }
 0x811   : > { %2218 = vpow2.f32 %v1382_v4 }
 0x81e   : > { %v2219_v5 = vpop.eup %2218 }
 0x81f   : > { %v1384_v6 = vsel %vm854_vm2, %v2219_v5, 0.0 }
 0x820   : > { %1385 = vadd.xlane.f32.xlu0 %v1384_v6 }
 0x836   : > { %1390 = vrot.lane.b32.xlu0 %v2848_v41, %s2504_s2  ;;  %s1724_s2 = sshll.u32 %s692_s20, 4  ;;  %s1725_s2 = int_to_ptr.vmem [resolvable:$true] %s1724_s2 }
 0x837   : > { %s2410_s26 = scalar_lea.vmem %s1725_s2, 128  ;;  %p2417_p10 = scmp.lt.s32.totalorder %s1725_s2, %s2415_s0 }
 0x838   : > { %p2411_p2 = scmp.ne.s32.totalorder %s1725_s2, %s2410_s26  ;;  %p2418_p12 = scmp.lt.s32.totalorder %s2416_s1, %s2410_s26 }
 0x83a   : > { %v1321_v7 = vpop.f32.mrf.mxu0  ;;  %p2412_p8 = pnand %p2411_p2, %p3077_p5  ;;  %p2419_p1 = por %p2418_p12, %p2417_p10 }
 0x83b   : > { %v1327_v24 = vadd.f32 %v1321_v7, %v2883_v27 }
 0x83c   : > { %v2038_v8 = vpop.f32.mrf.mxu0  ;;  %p2413_p7 = pneg %p2412_p8 }
 0x83e   : > { %v1324_v12 = vpop.f32.mrf.mxu0  ;;  %p2420_p3 = pnand %p2419_p1, %p2413_p7 }
 0x840   : > { %v2039_v13 = vpop.f32.mrf.mxu0 }
 0x8a9   : > { %v1386_v14 = vpop.xlane.xlu0 %1385 }
 0x8aa   : > { %2220 = vrcp.f32 %v1386_v14 }
 0x8ad   : > { %v1391_v15 = vpop.permute.xlu0 %1390 }
 0x8ae   : > { %v1396_v16 = vsel %vm916_vm3, %v1391_v15, 0 }
 0x8af   : > { %2047 = vmatpush3.bf16.msra.mxu0 %v1396_v16  ;;  %v1926_v16 = vld [vmem:[%s3023_s16] ss:$0 sm:$0xff] }
 0x8b0   : > { %2058 = vmatprep.subr.bf16.mxu0 %v2497_v0 }
 0x8b7   : > { %v2221_v41 = vpop.eup %2220 }
 0x8b8   : > { %v1388_v17 = vmul.f32 %v2221_v41, %v2219_v5 }
 0x8ba   : > { %v1389_v18 = vpack.c.bf16 %v1388_v17, %v1388_v17  ;;  %v1927_v17 = vld [vmem:[%s3075_s29] ss:$0 sm:$0xff] }
 0x8bc   : > { %2049 = vmatmul.mubr.msk.bf16.vlgmr.msra.gmra.mxu0 %vm854_vm2, %v1389_v18 }
 0x8bd   : > { %2062 = vmatprep.mubr.msk.bf16.mxu0 %vm2498_vm0, %v2497_v0  ;;  %2059 = vmatpush3.bf16.msra.mxu0 %v2200_v39 }
 0x8be   : > { %2060 = vmatprep.subr.bf16.mxu0 %v2497_v0 }
 0x97c   : > { %v1432_v19 = vpop.f32.mrf.mxu0 }
 0x97d   : > { %v1438_v20 = vpack.c.bf16 %v1432_v19, %v1432_v19 }
 0x97e   : > { %v2050_v21 = vpop.f32.mrf.mxu0 }
 0x97f   : > { %2055 = vmatmul.mubr.msk.bf16.vlgmr.msra.gmra.mxu1 %vm854_vm2, %v1438_v20 }
 0x980   : > { %v1435_v22 = vpop.f32.mrf.mxu0  ;;  %2074 = vmatprep.mubr.msk.bf16.mxu1 %vm2498_vm0, %v2497_v0  ;;  %2067 = vmatpush3.bf16.msra.mxu1 %v2202_v40 }
 0x981   : > { %2068 = vmatprep.subr.bf16.mxu1 %v2497_v0 }
 0x982   : > { %v2051_v23 = vpop.f32.mrf.mxu0 }
 0x984   : > { %2069 = vmatpush3.bf16.msra.mxu1 %v2203_v42 }
 0x985   : > { %2070 = vmatprep.subr.bf16.mxu1 %v2497_v0 }
 0x988   : > { %2071 = vmatpush3.bf16.msra.mxu1 %v2204_v52 }
 0x989   : > { %2072 = vmatprep.subr.bf16.mxu1 %v2497_v0  ;;  %v1920_v0 = vld [vmem:[%s3020_s13] ss:$0 sm:$0xff] }
 0x98c   : > { %2073 = vmatpush3.bf16.msra.mxu1 %v2205_v53 }
 0xa3f   : > { %v1481_v25 = vpop.f32.mrf.mxu1 }
 0xa40   : > { %v1487_v27 = vadd.f32 %v1481_v25, %v1327_v24 }
 0xa41   : > { %v2056_v28 = vpop.f32.mrf.mxu1 }
 0xa42   : > { %v1495_v29 = vadd.f32 %v1913_v26, %v1487_v27 }
 0xa43   : > { %v1484_v30 = vpop.f32.mrf.mxu1 }
 0xa44   : > { %v1496_v31 = vadd.f32 %v1495_v29, %v2808_v3  ;;  %v2201_v3 = vld [vmem:[%s3017_s10] sm:$0xff]  }
 0xa45   : > { %v2057_v32 = vpop.f32.mrf.mxu1  ;;  %2061 = vmatpush3.bf16.msra.mxu0 %v2201_v3 }
 0xa46   : > { %v1497_v33 = vsel %vm739_vm1, %v1496_v31, 0.0 }
 0xa47   : > { %1498 = vadd.xlane.f32.xlu1 %v1497_v33 }
 0xad0   : > { %v1499_v34 = vpop.xlane.xlu1 %1498 }
 0xad1   : > { %v1501_v35 = vmul.f32 0.03125, %v1499_v34 }
 0xad3   : > { %v1502_v36 = vsub.f32 %v1496_v31, %v1501_v35 }
 0xad5   : > { %v1503_v37 = vmul.f32 %v1502_v36, %v1502_v36 }
 0xad7   : > { %v1504_v38 = vsel %vm739_vm1, %v1503_v37, 0.0 }
 0xad8   : > { %1505 = vadd.xlane.f32.xlu1 %v1504_v38 }
 0xb61   : > { %v1506_v43 = vpop.xlane.xlu1 %1505 }
 0xb62   : > { %v1507_v44 = vmul.f32 0.03125, %v1506_v43 }
 0xb64   : > { %v1508_v45 = vadd.f32 1e-05, %v1507_v44 }
 0xb66   : > { %2222 = vrsqrt.f32 %v1508_v45 }
 0xb73   : > { %v2223_v46 = vpop.eup %2222 }
 0xb74   : > { %v1510_v48 = vmul.f32 %v2223_v46, %v1502_v36 }
 0xb76   : > { %v1518_v50 = vmul.f32 %v1914_v47, %v1510_v48 }
 0xb78   : > { %v1526_v51 = vadd.f32 %v1915_v49, %v1518_v50 }
 0xb7a   : > { %v1527_v11 = vpack.c.bf16 %v1526_v51, %v1526_v51 }
 0xb7c   : > { %2063 = vmatmul.mubr.msk.bf16.vlgmr.msra.gmra.mxu0 %vm739_vm1, %v1527_v11 }
 0xc3c   : > { %v1588_v55 = vpop.f32.mrf.mxu0 }
 0xc3d   : > { %v1589_v56 = vadd.f32 %v1916_v54, %v1588_v55 }
 0xc3e   : > { %v2064_v57 = vpop.f32.mrf.mxu0 }
 0xc3f   : > { %v1594_v58 = vmax.f32 %v1589_v56, 0.0 }
 0xc40   : > { %v1591_v59 = vpop.f32.mrf.mxu0 }
 0xc41   : > { %v1595_v60 = vpack.c.bf16 %v1594_v58, %v1594_v58 }
 0xc42   : > { %v2065_v61 = vpop.f32.mrf.mxu0 }
 0xc43   : > { %2075 = vmatmul.mubr.msk.bf16.vlgmr.msra.gmra.mxu1 %vm1635_vm4, %v1595_v60 }
 0xd03   : > { %v1673_v62 = vpop.f32.mrf.mxu1 }
 0xd04   : > { %v1674_v63 = vadd.f32 %v1920_v0, %v1673_v62 }
 0xd05   : > { %v2076_v1 = vpop.f32.mrf.mxu1 }
 0xd06   : > { %v1679_v2 = vadd.f32 %v1674_v63, %v1526_v51 }
 0xd07   : > { %v1676_v4 = vpop.f32.mrf.mxu1 }
 0xd08   : > { %v1680_v5 = vsel %vm739_vm1, %v1679_v2, 0.0 }
 0xd09   : > { %1681 = vadd.xlane.f32.xlu1 %v1680_v5  ;;  %v2077_v6 = vpop.f32.mrf.mxu1 }
 0xd92   : > { %v1682_v7 = vpop.xlane.xlu1 %1681 }
 0xd93   : > { %v1683_v24 = vmul.f32 0.03125, %v1682_v7 }
 0xd95   : > { %v1684_v8 = vsub.f32 %v1679_v2, %v1683_v24 }
 0xd97   : > { %v1685_v9 = vmul.f32 %v1684_v8, %v1684_v8 }
 0xd99   : > { %v1686_v10 = vsel %vm739_vm1, %v1685_v9, 0.0 }
 0xd9a   : > { %1687 = vadd.xlane.f32.xlu1 %v1686_v10 }
 0xe23   : > { %v1688_v12 = vpop.xlane.xlu1 %1687 }
 0xe24   : > { %v1689_v13 = vmul.f32 0.03125, %v1688_v12 }
 0xe26   : > { %v1690_v14 = vadd.f32 1e-05, %v1689_v13 }
 0xe28   : > { %2224 = vrsqrt.f32 %v1690_v14 }
 0xe35   : > { %v2225_v15 = vpop.eup %2224 }
 0xe36   : > { %v1692_v41 = vmul.f32 %v2225_v15, %v1684_v8 }
 0xe38   : > { %v1700_v18 = vmul.f32 %v1926_v16, %v1692_v41 }
 0xe3a   : > { %v1708_v19 = vadd.f32 %v1927_v17, %v1700_v18 }
 0xe3c   : > { %1709 = vst.msk [vmem:[%s692_s20] sm:$0xff] %vm739_vm1, %v1708_v19 }
 0xe3d   : > { %2423 = shalt.err (!%p2420_p3)
}
 0xe3e   : > { %s2424_s17 = scalar_lea.hbm %s1722_s3, 128  ;;  %s2428_s8 = scalar_lea.hbm %s3076_s6, 256 }
 0xe3f   : > { %p2425_p6 = scmp.ne.s32.totalorder %s1722_s3, %s2424_s17  ;;  %p2429_p11 = scmp.lt.s32.totalorder %s1722_s3, %s3076_s6 }
 0xe40   : > { %p2430_p13 = scmp.lt.s32.totalorder %s2428_s8, %s2424_s17 }
 0xe41   : > { %p2426_p4 = pnand %p2425_p6, %p3077_p5 }
 0xe42   : > { %p2431_p0 = por %p2430_p13, %p2429_p11 }
 0xe43   : > { %p2427_p9 = pneg %p2426_p4 }
 0xe45   : > { %p2432_p2 = pnand %p2431_p0, %p2427_p9 }
 0xe47   : > { %2435 = shalt.err (!%p2432_p2)
}
 0xe48   : > { %2104 = dma.vmem_to_hbm [thread:$0]  (%p3077_p5), %s1725_s2, 128, %s1722_s3, %s1711_s25  }
 0xe49 PF: > { %s1736_s20 = sand.u32 1, %s2474_s27   ;;  %p3078_p8 = scmp.ne.s32.totalorder %s3062_s21, 0 }
 0xe4a   : > { %p3079_p7 = scmp.ge.s32.totalorder %s2486_s30, 2  ;;  %s1737_s23 = scalar_lea.sflag [#allocation4], %s1736_s20 }
 0xe4c   : > { %p2130_p10 = pnand %p3079_p7, %p3078_p8 }
 0xe4e   : > { %p2131_p12 = pneg %p2130_p10 }
 0xe50   : > { %2469 = dma.done.wait (%p2131_p12), %s1737_s23, 128  }
 0xe51   : > { %2471 = vsyncadd (%p2131_p12), %s1737_s23, 4294967168  ;;  %s3080_s30 = sld [smem:[#allocation21_spill]]  ;;  %s3083_s27 = smov %s2478_s28 }
 0xe52   : > { %s3081_s24 = sld [smem:[#allocation20_spill]] }
 0xe53   : > { %s3082_s29 = sld [smem:[#allocation22_spill]] }
 0xe57   : > { %p34_p1 = scmp.ge.s32.totalorder %s3080_s30, 4  }
 0xe58   : > { %s3084_s28 = smov %s3081_s24 }
 0xe59   :  { %36 = sbr.rel (!%p34_p1) target bundleno = 20 (0x14), region = 170 }
 0xe5e   :  { %1742 = vsyncpa [#allocation3], 1 }
 0xe5f   :  { %1744 = vsyncpa [#allocation3 + $0x1], 1 }
 0xe60   :  { %1745 = vsyncpa [#allocation6], 1 }
 0xe61   :  { %1746 = vsyncpa [#allocation9], 1 }
 0xe62   :  { %1747 = vsyncpa [#allocation12], 1 }
 0xe63   :  { %1748 = vsyncpa [#allocation4], 1 }
 0xe64   :  { %1750 = vsyncpa [#allocation4 + $0x1], 1 }

</bundles_post_ra>
